<compile_context>
chip_gen: v5e
topology: v5e:2x2
jax: 0.10.0
libtpu: 0.0.40
codegen_flags: <defaults>
</compile_context>

<pallas_src>
import functools

import jax
import jax.numpy as jnp
from jax.experimental import pallas as pl
from jax.experimental.pallas import tpu as pltpu


# --------------------------- fused forward kernel ----------------------------
def _build_fused_forward(T, BP, input_size, hidden_sizes, output_size):
    """BP is the sublane-padded batch (multiple of 8)."""
    n_layers = len(hidden_sizes)
    dims = (input_size,) + tuple(hidden_sizes)
    n_inputs = 1 + 5 * n_layers + 2           # x, 5 fused params per layer, fc_w, fc_b
    n_outputs = 1 + n_layers                  # y, h_last per layer

    def kernel(*refs):
        it = iter(refs)
        x_ref = next(it)                                        # (T*BP, D_in)
        layer_refs = [[next(it) for _ in range(5)] for _ in range(n_layers)]
        fcw_ref = next(it)                                      # (H_last, O)
        fcb_ref = next(it)                                      # (1, O)
        y_ref = next(it)                                        # (BP, O)
        hlast_refs = [next(it) for _ in range(n_layers)]        # (BP, H_l)
        seq_refs = [next(it) for _ in range(n_layers - 1)]      # VMEM scratch (T*BP, H_l)

        x2 = x_ref[...]                                         # (T*BP, D_in)
        h = None
        for li in range(n_layers):
            (h0_ref, wih_ref, whh_ref, bi_ref, bhn_ref) = layer_refs[li]
            D, H = dims[li], dims[li + 1]
            last_layer = li == n_layers - 1

            # ---- hoisted input projection, all gates fused: (T*BP, 3H) ----
            if D == 1:
                # K=1 contraction == outer product -> single VPU broadcast-multiply.
                gi = x2 * wih_ref[...] + bi_ref[...]
            else:
                gi = jnp.dot(x2, wih_ref[...],
                             preferred_element_type=jnp.float32) + bi_ref[...]

            whh = whh_ref[...]                                  # (H, 3H)
            # hoisted out of the unrolled loop (no per-step re-broadcast)
            bhn_b = jnp.broadcast_to(bhn_ref[...], (BP, H))     # (BP, H)
            h = h0_ref[...]                                     # (BP, H)

            # ---- fully-unrolled recurrence (time grid collapsed) ----
            for t in range(T):
                lo = t * BP                                     # sublane-aligned offset
                gi_t = gi[lo:lo + BP, :]                        # (BP, 3H) full tile
                gh = jnp.dot(h, whh,
                             preferred_element_type=jnp.float32)  # one MXU issue/step
                # fused r|z sigmoid: one EUP push for both gates
                rz = jax.nn.sigmoid(gi_t[:, :2 * H] + gh[:, :2 * H])
                r = rz[:, :H]
                z = rz[:, H:2 * H]
                n = jnp.tanh(gi_t[:, 2 * H:] + r * (gh[:, 2 * H:] + bhn_b))
                h = (1.0 - z) * n + z * h
                if not last_layer:
                    seq_refs[li][lo:lo + BP, :] = h             # aligned, unmasked store

            hlast_refs[li][...] = h                             # written once per layer
            if not last_layer:
                x2 = seq_refs[li][...]                          # (T*BP, H) next input

        # ---- FC + tanh on the last layer's final hidden state ----
        y_ref[...] = jnp.tanh(
            jnp.dot(h, fcw_ref[...], preferred_element_type=jnp.float32) + fcb_ref[...])

    vmem_spec = pl.BlockSpec(memory_space=pltpu.MemorySpace.VMEM)
    out_shape = tuple(
        [jax.ShapeDtypeStruct((BP, output_size), jnp.float32)]
        + [jax.ShapeDtypeStruct((BP, hs), jnp.float32) for hs in hidden_sizes])
    scratch_shapes = [pltpu.VMEM((T * BP, hs), jnp.float32) for hs in hidden_sizes[:-1]]

    return pl.pallas_call(
        kernel,
        out_shape=out_shape,
        in_specs=[vmem_spec] * n_inputs,
        out_specs=tuple([vmem_spec] * n_outputs),
        scratch_shapes=scratch_shapes,
    )


@functools.lru_cache(maxsize=None)
def _get_fused_forward(T, BP, input_size, hidden_sizes, output_size):
    return _build_fused_forward(T, BP, input_size, hidden_sizes, output_size)


# ------------------------------- model wrapper --------------------------------
class GRUModelPallas:
    def __init__(self, input_size=1, hidden_sizes=(32, 16), output_size=8, key=None):
        self.input_size = input_size
        self.hidden_sizes = tuple(hidden_sizes)
        self.output_size = output_size
        key = jax.random.PRNGKey(42) if key is None else key

        # PyTorch-convention parameters (also used by the pure-JAX reference).
        self.params = []
        in_sz = input_size
        for h_sz in self.hidden_sizes:
            key, k1, k2, k3, k4 = jax.random.split(key, 5)
            bound = 1.0 / jnp.sqrt(h_sz)
            layer = dict(
                w_ih=jax.random.uniform(k1, (3 * h_sz, in_sz), jnp.float32, -bound, bound),
                w_hh=jax.random.uniform(k2, (3 * h_sz, h_sz), jnp.float32, -bound, bound),
                b_ih=jax.random.uniform(k3, (3 * h_sz,), jnp.float32, -bound, bound),
                b_hh=jax.random.uniform(k4, (3 * h_sz,), jnp.float32, -bound, bound),
            )
            self.params.append(layer)
            in_sz = h_sz
        key, k1, k2 = jax.random.split(key, 3)
        bound = 1.0 / jnp.sqrt(self.hidden_sizes[-1])
        self.fc_w = jax.random.uniform(k1, (output_size, self.hidden_sizes[-1]),
                                       jnp.float32, -bound, bound)
        self.fc_b = jax.random.uniform(k2, (output_size,), jnp.float32, -bound, bound)

        # Kernel-layout parameters: transposed, gate-fused (r|z|n), biases pre-folded.
        #   r/z: sigma(x Wi^T + b_i + h Wh^T + b_h)       -> fold b_i + b_h into one bias.
        #   n  : tanh(x Win^T + b_in + r*(h Whn^T + b_hn)) -> keep b_hn separate.
        self._kparams = []
        for p, h_sz in zip(self.params, self.hidden_sizes):
            H = h_sz
            w_ih, w_hh, b_ih, b_hh = p["w_ih"], p["w_hh"], p["b_ih"], p["b_hh"]
            bi_fused = jnp.concatenate(
                [b_ih[0:H] + b_hh[0:H],                 # r
                 b_ih[H:2 * H] + b_hh[H:2 * H],         # z
                 b_ih[2 * H:3 * H]],                    # n (input-side only)
                axis=0).reshape(1, 3 * H)
            self._kparams.append(dict(
                wih_rzn=jnp.transpose(w_ih),            # (D, 3H), gate order r|z|n
                whh_rzn=jnp.transpose(w_hh),            # (H, 3H), gate order r|z|n
                bi_rzn=bi_fused,                        # (1, 3H)
                bh_n=b_hh[2 * H:3 * H].reshape(1, H),   # (1, H)
            ))
        self._fc_w_t = jnp.transpose(self.fc_w)         # (H_last, O)
        self._fc_b_row = self.fc_b.reshape(1, -1)       # (1, O)

        # One jitted dispatch: layout ops + pallas_call + output slicing all fused.
        self._jit_forward = jax.jit(self._forward)

    def init_hidden(self, batch_size):
        return [jnp.zeros((1, batch_size, h), jnp.float32) for h in self.hidden_sizes]

    def _forward(self, x, h):
        B, T, D = x.shape
        BP = ((B + 7) // 8) * 8                          # sublane-padded batch
        x_t = jnp.transpose(x, (1, 0, 2))                # (T, B, D) time-major
        x_p = jnp.zeros((T, BP, D), jnp.float32).at[:, :B, :].set(x_t)
        x2 = x_p.reshape(T * BP, D)                      # 8-row stride per time step

        args = [x2]
        for i, kp in enumerate(self._kparams):
            h0 = h[i][0]
            h0p = jnp.zeros((BP, h0.shape[1]), jnp.float32).at[:B, :].set(h0)
            args += [h0p, kp["wih_rzn"], kp["whh_rzn"], kp["bi_rzn"], kp["bh_n"]]
        args += [self._fc_w_t, self._fc_b_row]

        fwd = _get_fused_forward(T, BP, self.input_size, self.hidden_sizes,
                                 self.output_size)
        outs = fwd(*args)
        y = outs[0][:B]
        h_out = [hl[None, :B, :] for hl in outs[1:]]     # (1, B, H) like torch
        return y, h_out

    def __call__(self, x, h):
        return self._jit_forward(x, h)


# ------------------------------ pure-JAX reference ----------------------------
def _gru_layer_ref(x_tbd, h0, w_ih, w_hh, b_ih, b_hh):
    H = h0.shape[1]

    def step(h, x_t):
        gi = x_t @ w_ih.T + b_ih
        gh = h @ w_hh.T + b_hh
        r = jax.nn.sigmoid(gi[:, :H] + gh[:, :H])
        z = jax.nn.sigmoid(gi[:, H:2 * H] + gh[:, H:2 * H])
        n = jnp.tanh(gi[:, 2 * H:] + r * gh[:, 2 * H:])
        h_new = (1.0 - z) * n + z * h
        return h_new, h_new

    h_last, ys = jax.lax.scan(step, h0, x_tbd)
    return ys, h_last


def _model_ref(model, x, h):
    out = jnp.transpose(x, (1, 0, 2))
    h_lasts = []
    for i, p in enumerate(model.params):
        out, hl = _gru_layer_ref(out, h[i][0], p["w_ih"], p["w_hh"],
                                 p["b_ih"], p["b_hh"])
        h_lasts.append(hl[None, ...])
    y = jnp.tanh(out[-1] @ model.fc_w.T + model.fc_b)
    return y, h_lasts


# ------------------------------------ main ------------------------------------
if __name__ == "__main__":
    B, T = 2, 8
    input_size, hidden_sizes, output_size = 1, (32, 16), 8

    model = GRUModelPallas(input_size, hidden_sizes, output_size,
                           key=jax.random.PRNGKey(42))

    key = jax.random.PRNGKey(0)
    x = jax.random.normal(key, (B, T, input_size), jnp.float32)
    h0 = model.init_hidden(B)

    y, h_out = model(x, h0)
    jax.block_until_ready(y)
    for hi in h_out:
        jax.block_until_ready(hi)

    # sanity check vs pure-JAX reference
    y_ref, h_ref = _model_ref(model, x, h0)
    assert y.shape == (B, output_size)
    assert jnp.allclose(y, y_ref, rtol=1e-4, atol=1e-4), "y mismatch vs reference"
    for hi, hr in zip(h_out, h_ref):
        assert jnp.allclose(hi, hr, rtol=1e-4, atol=1e-4), "h mismatch vs reference"

    print("KERNEL_OK")
</pallas_src>

<mosaic_0001>
module attributes {stable_mosaic.version = 11 : i64} {
  func.func @kernel(%arg0: memref<64x1xf32, #tpu.memory_space<vmem>>, %arg1: memref<8x32xf32, #tpu.memory_space<vmem>>, %arg2: memref<1x96xf32, #tpu.memory_space<vmem>>, %arg3: memref<32x96xf32, #tpu.memory_space<vmem>>, %arg4: memref<1x96xf32, #tpu.memory_space<vmem>>, %arg5: memref<1x32xf32, #tpu.memory_space<vmem>>, %arg6: memref<8x16xf32, #tpu.memory_space<vmem>>, %arg7: memref<32x48xf32, #tpu.memory_space<vmem>>, %arg8: memref<16x48xf32, #tpu.memory_space<vmem>>, %arg9: memref<1x48xf32, #tpu.memory_space<vmem>>, %arg10: memref<1x16xf32, #tpu.memory_space<vmem>>, %arg11: memref<16x8xf32, #tpu.memory_space<vmem>>, %arg12: memref<1x8xf32, #tpu.memory_space<vmem>>, %arg13: memref<8x8xf32, #tpu.memory_space<vmem>>, %arg14: memref<8x32xf32, #tpu.memory_space<vmem>>, %arg15: memref<8x16xf32, #tpu.memory_space<vmem>>, %arg16: memref<64x32xf32, #tpu.memory_space<vmem>>) attributes {dimension_semantics = [], scalar_prefetch = 0 : i64, scratch_operands = 1 : i64, tpu.core_type = #tpu.core_type<tc>} {
    %c0 = arith.constant 0 : index
    %c0_0 = arith.constant 0 : index
    %0 = vector.load %arg0[%c0, %c0_0] : memref<64x1xf32, #tpu.memory_space<vmem>>, vector<64x1xf32>
    %c0_1 = arith.constant 0 : index
    %c0_2 = arith.constant 0 : index
    %1 = vector.load %arg2[%c0_1, %c0_2] : memref<1x96xf32, #tpu.memory_space<vmem>>, vector<1x96xf32>
    %2 = vector.broadcast %0 : vector<64x1xf32> to vector<64x96xf32>
    %3 = vector.broadcast %1 : vector<1x96xf32> to vector<64x96xf32>
    %4 = arith.mulf %2, %3 : vector<64x96xf32>
    %c0_3 = arith.constant 0 : index
    %c0_4 = arith.constant 0 : index
    %5 = vector.load %arg4[%c0_3, %c0_4] : memref<1x96xf32, #tpu.memory_space<vmem>>, vector<1x96xf32>
    %6 = vector.broadcast %5 : vector<1x96xf32> to vector<64x96xf32>
    %7 = arith.addf %4, %6 : vector<64x96xf32>
    %c0_5 = arith.constant 0 : index
    %c0_6 = arith.constant 0 : index
    %8 = vector.load %arg3[%c0_5, %c0_6] : memref<32x96xf32, #tpu.memory_space<vmem>>, vector<32x96xf32>
    %c0_7 = arith.constant 0 : index
    %c0_8 = arith.constant 0 : index
    %9 = vector.load %arg5[%c0_7, %c0_8] : memref<1x32xf32, #tpu.memory_space<vmem>>, vector<1x32xf32>
    %10 = vector.shape_cast %9 : vector<1x32xf32> to vector<1x32xf32>
    %11 = vector.broadcast %10 : vector<1x32xf32> to vector<8x32xf32>
    %c0_9 = arith.constant 0 : index
    %c0_10 = arith.constant 0 : index
    %12 = vector.load %arg1[%c0_9, %c0_10] : memref<8x32xf32, #tpu.memory_space<vmem>>, vector<8x32xf32>
    %13 = vector.extract_strided_slice %7 {offsets = [0, 0], sizes = [8, 96], strides = [1, 1]} : vector<64x96xf32> to vector<8x96xf32>
    %cst = arith.constant dense<0.000000e+00> : vector<8x96xf32>
    %14 = tpu.matmul %12, %8, %cst {dimension_numbers = #tpu.dot_dimension_numbers<[1], [0], [0], [1], [0, 0, 1, 1], [], []>} : vector<8x32xf32>, vector<32x96xf32>, vector<8x96xf32> -> vector<8x96xf32>
    %15 = vector.extract_strided_slice %13 {offsets = [0, 0], sizes = [8, 64], strides = [1, 1]} : vector<8x96xf32> to vector<8x64xf32>
    %16 = vector.extract_strided_slice %14 {offsets = [0, 0], sizes = [8, 64], strides = [1, 1]} : vector<8x96xf32> to vector<8x64xf32>
    %17 = arith.addf %15, %16 : vector<8x64xf32>
    %18 = arith.negf %17 : vector<8x64xf32>
    %19 = math.exp %18 : vector<8x64xf32>
    %cst_11 = arith.constant 1.000000e+00 : f32
    %20 = vector.broadcast %cst_11 : f32 to vector<8x64xf32>
    %21 = arith.addf %20, %19 : vector<8x64xf32>
    %22 = arith.divf %20, %21 : vector<8x64xf32>
    %23 = vector.extract_strided_slice %22 {offsets = [0, 0], sizes = [8, 32], strides = [1, 1]} : vector<8x64xf32> to vector<8x32xf32>
    %24 = vector.extract_strided_slice %22 {offsets = [0, 32], sizes = [8, 32], strides = [1, 1]} : vector<8x64xf32> to vector<8x32xf32>
    %25 = vector.extract_strided_slice %13 {offsets = [0, 64], sizes = [8, 32], strides = [1, 1]} : vector<8x96xf32> to vector<8x32xf32>
    %26 = vector.extract_strided_slice %14 {offsets = [0, 64], sizes = [8, 32], strides = [1, 1]} : vector<8x96xf32> to vector<8x32xf32>
    %27 = arith.addf %26, %11 : vector<8x32xf32>
    %28 = arith.mulf %23, %27 : vector<8x32xf32>
    %29 = arith.addf %25, %28 : vector<8x32xf32>
    %30 = math.tanh %29 : vector<8x32xf32>
    %cst_12 = arith.constant 1.000000e+00 : f32
    %31 = vector.broadcast %cst_12 : f32 to vector<8x32xf32>
    %32 = arith.subf %31, %24 : vector<8x32xf32>
    %33 = arith.mulf %32, %30 : vector<8x32xf32>
    %34 = arith.mulf %24, %12 : vector<8x32xf32>
    %35 = arith.addf %33, %34 : vector<8x32xf32>
    %c0_13 = arith.constant 0 : index
    %c0_14 = arith.constant 0 : index
    %36 = vector.load %arg16[%c0_13, %c0_14] : memref<64x32xf32, #tpu.memory_space<vmem>>, vector<8x32xf32>
    tpu.vector_store %arg16[%c0_13, %c0_14], %35 {strides = array<i32>} : memref<64x32xf32, #tpu.memory_space<vmem>>, vector<8x32xf32>,
    %37 = vector.extract_strided_slice %7 {offsets = [8, 0], sizes = [8, 96], strides = [1, 1]} : vector<64x96xf32> to vector<8x96xf32>
    %cst_15 = arith.constant dense<0.000000e+00> : vector<8x96xf32>
    %38 = tpu.matmul %35, %8, %cst_15 {dimension_numbers = #tpu.dot_dimension_numbers<[1], [0], [0], [1], [0, 0, 1, 1], [], []>} : vector<8x32xf32>, vector<32x96xf32>, vector<8x96xf32> -> vector<8x96xf32>
    %39 = vector.extract_strided_slice %37 {offsets = [0, 0], sizes = [8, 64], strides = [1, 1]} : vector<8x96xf32> to vector<8x64xf32>
    %40 = vector.extract_strided_slice %38 {offsets = [0, 0], sizes = [8, 64], strides = [1, 1]} : vector<8x96xf32> to vector<8x64xf32>
    %41 = arith.addf %39, %40 : vector<8x64xf32>
    %42 = arith.negf %41 : vector<8x64xf32>
    %43 = math.exp %42 : vector<8x64xf32>
    %cst_16 = arith.constant 1.000000e+00 : f32
    %44 = vector.broadcast %cst_16 : f32 to vector<8x64xf32>
    %45 = arith.addf %44, %43 : vector<8x64xf32>
    %46 = arith.divf %44, %45 : vector<8x64xf32>
    %47 = vector.extract_strided_slice %46 {offsets = [0, 0], sizes = [8, 32], strides = [1, 1]} : vector<8x64xf32> to vector<8x32xf32>
    %48 = vector.extract_strided_slice %46 {offsets = [0, 32], sizes = [8, 32], strides = [1, 1]} : vector<8x64xf32> to vector<8x32xf32>
    %49 = vector.extract_strided_slice %37 {offsets = [0, 64], sizes = [8, 32], strides = [1, 1]} : vector<8x96xf32> to vector<8x32xf32>
    %50 = vector.extract_strided_slice %38 {offsets = [0, 64], sizes = [8, 32], strides = [1, 1]} : vector<8x96xf32> to vector<8x32xf32>
    %51 = arith.addf %50, %11 : vector<8x32xf32>
    %52 = arith.mulf %47, %51 : vector<8x32xf32>
    %53 = arith.addf %49, %52 : vector<8x32xf32>
    %54 = math.tanh %53 : vector<8x32xf32>
    %cst_17 = arith.constant 1.000000e+00 : f32
    %55 = vector.broadcast %cst_17 : f32 to vector<8x32xf32>
    %56 = arith.subf %55, %48 : vector<8x32xf32>
    %57 = arith.mulf %56, %54 : vector<8x32xf32>
    %58 = arith.mulf %48, %35 : vector<8x32xf32>
    %59 = arith.addf %57, %58 : vector<8x32xf32>
    %c8 = arith.constant 8 : index
    %c0_18 = arith.constant 0 : index
    %60 = vector.load %arg16[%c8, %c0_18] : memref<64x32xf32, #tpu.memory_space<vmem>>, vector<8x32xf32>
    tpu.vector_store %arg16[%c8, %c0_18], %59 {strides = array<i32>} : memref<64x32xf32, #tpu.memory_space<vmem>>, vector<8x32xf32>,
    %61 = vector.extract_strided_slice %7 {offsets = [16, 0], sizes = [8, 96], strides = [1, 1]} : vector<64x96xf32> to vector<8x96xf32>
    %cst_19 = arith.constant dense<0.000000e+00> : vector<8x96xf32>
    %62 = tpu.matmul %59, %8, %cst_19 {dimension_numbers = #tpu.dot_dimension_numbers<[1], [0], [0], [1], [0, 0, 1, 1], [], []>} : vector<8x32xf32>, vector<32x96xf32>, vector<8x96xf32> -> vector<8x96xf32>
    %63 = vector.extract_strided_slice %61 {offsets = [0, 0], sizes = [8, 64], strides = [1, 1]} : vector<8x96xf32> to vector<8x64xf32>
    %64 = vector.extract_strided_slice %62 {offsets = [0, 0], sizes = [8, 64], strides = [1, 1]} : vector<8x96xf32> to vector<8x64xf32>
    %65 = arith.addf %63, %64 : vector<8x64xf32>
    %66 = arith.negf %65 : vector<8x64xf32>
    %67 = math.exp %66 : vector<8x64xf32>
    %cst_20 = arith.constant 1.000000e+00 : f32
    %68 = vector.broadcast %cst_20 : f32 to vector<8x64xf32>
    %69 = arith.addf %68, %67 : vector<8x64xf32>
    %70 = arith.divf %68, %69 : vector<8x64xf32>
    %71 = vector.extract_strided_slice %70 {offsets = [0, 0], sizes = [8, 32], strides = [1, 1]} : vector<8x64xf32> to vector<8x32xf32>
    %72 = vector.extract_strided_slice %70 {offsets = [0, 32], sizes = [8, 32], strides = [1, 1]} : vector<8x64xf32> to vector<8x32xf32>
    %73 = vector.extract_strided_slice %61 {offsets = [0, 64], sizes = [8, 32], strides = [1, 1]} : vector<8x96xf32> to vector<8x32xf32>
    %74 = vector.extract_strided_slice %62 {offsets = [0, 64], sizes = [8, 32], strides = [1, 1]} : vector<8x96xf32> to vector<8x32xf32>
    %75 = arith.addf %74, %11 : vector<8x32xf32>
    %76 = arith.mulf %71, %75 : vector<8x32xf32>
    %77 = arith.addf %73, %76 : vector<8x32xf32>
    %78 = math.tanh %77 : vector<8x32xf32>
    %cst_21 = arith.constant 1.000000e+00 : f32
    %79 = vector.broadcast %cst_21 : f32 to vector<8x32xf32>
    %80 = arith.subf %79, %72 : vector<8x32xf32>
    %81 = arith.mulf %80, %78 : vector<8x32xf32>
    %82 = arith.mulf %72, %59 : vector<8x32xf32>
    %83 = arith.addf %81, %82 : vector<8x32xf32>
    %c16 = arith.constant 16 : index
    %c0_22 = arith.constant 0 : index
    %84 = vector.load %arg16[%c16, %c0_22] : memref<64x32xf32, #tpu.memory_space<vmem>>, vector<8x32xf32>
    tpu.vector_store %arg16[%c16, %c0_22], %83 {strides = array<i32>} : memref<64x32xf32, #tpu.memory_space<vmem>>, vector<8x32xf32>,
    %85 = vector.extract_strided_slice %7 {offsets = [24, 0], sizes = [8, 96], strides = [1, 1]} : vector<64x96xf32> to vector<8x96xf32>
    %cst_23 = arith.constant dense<0.000000e+00> : vector<8x96xf32>
    %86 = tpu.matmul %83, %8, %cst_23 {dimension_numbers = #tpu.dot_dimension_numbers<[1], [0], [0], [1], [0, 0, 1, 1], [], []>} : vector<8x32xf32>, vector<32x96xf32>, vector<8x96xf32> -> vector<8x96xf32>
    %87 = vector.extract_strided_slice %85 {offsets = [0, 0], sizes = [8, 64], strides = [1, 1]} : vector<8x96xf32> to vector<8x64xf32>
    %88 = vector.extract_strided_slice %86 {offsets = [0, 0], sizes = [8, 64], strides = [1, 1]} : vector<8x96xf32> to vector<8x64xf32>
    %89 = arith.addf %87, %88 : vector<8x64xf32>
    %90 = arith.negf %89 : vector<8x64xf32>
    %91 = math.exp %90 : vector<8x64xf32>
    %cst_24 = arith.constant 1.000000e+00 : f32
    %92 = vector.broadcast %cst_24 : f32 to vector<8x64xf32>
    %93 = arith.addf %92, %91 : vector<8x64xf32>
    %94 = arith.divf %92, %93 : vector<8x64xf32>
    %95 = vector.extract_strided_slice %94 {offsets = [0, 0], sizes = [8, 32], strides = [1, 1]} : vector<8x64xf32> to vector<8x32xf32>
    %96 = vector.extract_strided_slice %94 {offsets = [0, 32], sizes = [8, 32], strides = [1, 1]} : vector<8x64xf32> to vector<8x32xf32>
    %97 = vector.extract_strided_slice %85 {offsets = [0, 64], sizes = [8, 32], strides = [1, 1]} : vector<8x96xf32> to vector<8x32xf32>
    %98 = vector.extract_strided_slice %86 {offsets = [0, 64], sizes = [8, 32], strides = [1, 1]} : vector<8x96xf32> to vector<8x32xf32>
    %99 = arith.addf %98, %11 : vector<8x32xf32>
    %100 = arith.mulf %95, %99 : vector<8x32xf32>
    %101 = arith.addf %97, %100 : vector<8x32xf32>
    %102 = math.tanh %101 : vector<8x32xf32>
    %cst_25 = arith.constant 1.000000e+00 : f32
    %103 = vector.broadcast %cst_25 : f32 to vector<8x32xf32>
    %104 = arith.subf %103, %96 : vector<8x32xf32>
    %105 = arith.mulf %104, %102 : vector<8x32xf32>
    %106 = arith.mulf %96, %83 : vector<8x32xf32>
    %107 = arith.addf %105, %106 : vector<8x32xf32>
    %c24 = arith.constant 24 : index
    %c0_26 = arith.constant 0 : index
    %108 = vector.load %arg16[%c24, %c0_26] : memref<64x32xf32, #tpu.memory_space<vmem>>, vector<8x32xf32>
    tpu.vector_store %arg16[%c24, %c0_26], %107 {strides = array<i32>} : memref<64x32xf32, #tpu.memory_space<vmem>>, vector<8x32xf32>,
    %109 = vector.extract_strided_slice %7 {offsets = [32, 0], sizes = [8, 96], strides = [1, 1]} : vector<64x96xf32> to vector<8x96xf32>
    %cst_27 = arith.constant dense<0.000000e+00> : vector<8x96xf32>
    %110 = tpu.matmul %107, %8, %cst_27 {dimension_numbers = #tpu.dot_dimension_numbers<[1], [0], [0], [1], [0, 0, 1, 1], [], []>} : vector<8x32xf32>, vector<32x96xf32>, vector<8x96xf32> -> vector<8x96xf32>
    %111 = vector.extract_strided_slice %109 {offsets = [0, 0], sizes = [8, 64], strides = [1, 1]} : vector<8x96xf32> to vector<8x64xf32>
    %112 = vector.extract_strided_slice %110 {offsets = [0, 0], sizes = [8, 64], strides = [1, 1]} : vector<8x96xf32> to vector<8x64xf32>
    %113 = arith.addf %111, %112 : vector<8x64xf32>
    %114 = arith.negf %113 : vector<8x64xf32>
    %115 = math.exp %114 : vector<8x64xf32>
    %cst_28 = arith.constant 1.000000e+00 : f32
    %116 = vector.broadcast %cst_28 : f32 to vector<8x64xf32>
    %117 = arith.addf %116, %115 : vector<8x64xf32>
    %118 = arith.divf %116, %117 : vector<8x64xf32>
    %119 = vector.extract_strided_slice %118 {offsets = [0, 0], sizes = [8, 32], strides = [1, 1]} : vector<8x64xf32> to vector<8x32xf32>
    %120 = vector.extract_strided_slice %118 {offsets = [0, 32], sizes = [8, 32], strides = [1, 1]} : vector<8x64xf32> to vector<8x32xf32>
    %121 = vector.extract_strided_slice %109 {offsets = [0, 64], sizes = [8, 32], strides = [1, 1]} : vector<8x96xf32> to vector<8x32xf32>
    %122 = vector.extract_strided_slice %110 {offsets = [0, 64], sizes = [8, 32], strides = [1, 1]} : vector<8x96xf32> to vector<8x32xf32>
    %123 = arith.addf %122, %11 : vector<8x32xf32>
    %124 = arith.mulf %119, %123 : vector<8x32xf32>
    %125 = arith.addf %121, %124 : vector<8x32xf32>
    %126 = math.tanh %125 : vector<8x32xf32>
    %cst_29 = arith.constant 1.000000e+00 : f32
    %127 = vector.broadcast %cst_29 : f32 to vector<8x32xf32>
    %128 = arith.subf %127, %120 : vector<8x32xf32>
    %129 = arith.mulf %128, %126 : vector<8x32xf32>
    %130 = arith.mulf %120, %107 : vector<8x32xf32>
    %131 = arith.addf %129, %130 : vector<8x32xf32>
    %c32 = arith.constant 32 : index
    %c0_30 = arith.constant 0 : index
    %132 = vector.load %arg16[%c32, %c0_30] : memref<64x32xf32, #tpu.memory_space<vmem>>, vector<8x32xf32>
    tpu.vector_store %arg16[%c32, %c0_30], %131 {strides = array<i32>} : memref<64x32xf32, #tpu.memory_space<vmem>>, vector<8x32xf32>,
    %133 = vector.extract_strided_slice %7 {offsets = [40, 0], sizes = [8, 96], strides = [1, 1]} : vector<64x96xf32> to vector<8x96xf32>
    %cst_31 = arith.constant dense<0.000000e+00> : vector<8x96xf32>
    %134 = tpu.matmul %131, %8, %cst_31 {dimension_numbers = #tpu.dot_dimension_numbers<[1], [0], [0], [1], [0, 0, 1, 1], [], []>} : vector<8x32xf32>, vector<32x96xf32>, vector<8x96xf32> -> vector<8x96xf32>
    %135 = vector.extract_strided_slice %133 {offsets = [0, 0], sizes = [8, 64], strides = [1, 1]} : vector<8x96xf32> to vector<8x64xf32>
    %136 = vector.extract_strided_slice %134 {offsets = [0, 0], sizes = [8, 64], strides = [1, 1]} : vector<8x96xf32> to vector<8x64xf32>
    %137 = arith.addf %135, %136 : vector<8x64xf32>
    %138 = arith.negf %137 : vector<8x64xf32>
    %139 = math.exp %138 : vector<8x64xf32>
    %cst_32 = arith.constant 1.000000e+00 : f32
    %140 = vector.broadcast %cst_32 : f32 to vector<8x64xf32>
    %141 = arith.addf %140, %139 : vector<8x64xf32>
    %142 = arith.divf %140, %141 : vector<8x64xf32>
    %143 = vector.extract_strided_slice %142 {offsets = [0, 0], sizes = [8, 32], strides = [1, 1]} : vector<8x64xf32> to vector<8x32xf32>
    %144 = vector.extract_strided_slice %142 {offsets = [0, 32], sizes = [8, 32], strides = [1, 1]} : vector<8x64xf32> to vector<8x32xf32>
    %145 = vector.extract_strided_slice %133 {offsets = [0, 64], sizes = [8, 32], strides = [1, 1]} : vector<8x96xf32> to vector<8x32xf32>
    %146 = vector.extract_strided_slice %134 {offsets = [0, 64], sizes = [8, 32], strides = [1, 1]} : vector<8x96xf32> to vector<8x32xf32>
    %147 = arith.addf %146, %11 : vector<8x32xf32>
    %148 = arith.mulf %143, %147 : vector<8x32xf32>
    %149 = arith.addf %145, %148 : vector<8x32xf32>
    %150 = math.tanh %149 : vector<8x32xf32>
    %cst_33 = arith.constant 1.000000e+00 : f32
    %151 = vector.broadcast %cst_33 : f32 to vector<8x32xf32>
    %152 = arith.subf %151, %144 : vector<8x32xf32>
    %153 = arith.mulf %152, %150 : vector<8x32xf32>
    %154 = arith.mulf %144, %131 : vector<8x32xf32>
    %155 = arith.addf %153, %154 : vector<8x32xf32>
    %c40 = arith.constant 40 : index
    %c0_34 = arith.constant 0 : index
    %156 = vector.load %arg16[%c40, %c0_34] : memref<64x32xf32, #tpu.memory_space<vmem>>, vector<8x32xf32>
    tpu.vector_store %arg16[%c40, %c0_34], %155 {strides = array<i32>} : memref<64x32xf32, #tpu.memory_space<vmem>>, vector<8x32xf32>,
    %157 = vector.extract_strided_slice %7 {offsets = [48, 0], sizes = [8, 96], strides = [1, 1]} : vector<64x96xf32> to vector<8x96xf32>
    %cst_35 = arith.constant dense<0.000000e+00> : vector<8x96xf32>
    %158 = tpu.matmul %155, %8, %cst_35 {dimension_numbers = #tpu.dot_dimension_numbers<[1], [0], [0], [1], [0, 0, 1, 1], [], []>} : vector<8x32xf32>, vector<32x96xf32>, vector<8x96xf32> -> vector<8x96xf32>
    %159 = vector.extract_strided_slice %157 {offsets = [0, 0], sizes = [8, 64], strides = [1, 1]} : vector<8x96xf32> to vector<8x64xf32>
    %160 = vector.extract_strided_slice %158 {offsets = [0, 0], sizes = [8, 64], strides = [1, 1]} : vector<8x96xf32> to vector<8x64xf32>
    %161 = arith.addf %159, %160 : vector<8x64xf32>
    %162 = arith.negf %161 : vector<8x64xf32>
    %163 = math.exp %162 : vector<8x64xf32>
    %cst_36 = arith.constant 1.000000e+00 : f32
    %164 = vector.broadcast %cst_36 : f32 to vector<8x64xf32>
    %165 = arith.addf %164, %163 : vector<8x64xf32>
    %166 = arith.divf %164, %165 : vector<8x64xf32>
    %167 = vector.extract_strided_slice %166 {offsets = [0, 0], sizes = [8, 32], strides = [1, 1]} : vector<8x64xf32> to vector<8x32xf32>
    %168 = vector.extract_strided_slice %166 {offsets = [0, 32], sizes = [8, 32], strides = [1, 1]} : vector<8x64xf32> to vector<8x32xf32>
    %169 = vector.extract_strided_slice %157 {offsets = [0, 64], sizes = [8, 32], strides = [1, 1]} : vector<8x96xf32> to vector<8x32xf32>
    %170 = vector.extract_strided_slice %158 {offsets = [0, 64], sizes = [8, 32], strides = [1, 1]} : vector<8x96xf32> to vector<8x32xf32>
    %171 = arith.addf %170, %11 : vector<8x32xf32>
    %172 = arith.mulf %167, %171 : vector<8x32xf32>
    %173 = arith.addf %169, %172 : vector<8x32xf32>
    %174 = math.tanh %173 : vector<8x32xf32>
    %cst_37 = arith.constant 1.000000e+00 : f32
    %175 = vector.broadcast %cst_37 : f32 to vector<8x32xf32>
    %176 = arith.subf %175, %168 : vector<8x32xf32>
    %177 = arith.mulf %176, %174 : vector<8x32xf32>
    %178 = arith.mulf %168, %155 : vector<8x32xf32>
    %179 = arith.addf %177, %178 : vector<8x32xf32>
    %c48 = arith.constant 48 : index
    %c0_38 = arith.constant 0 : index
    %180 = vector.load %arg16[%c48, %c0_38] : memref<64x32xf32, #tpu.memory_space<vmem>>, vector<8x32xf32>
    tpu.vector_store %arg16[%c48, %c0_38], %179 {strides = array<i32>} : memref<64x32xf32, #tpu.memory_space<vmem>>, vector<8x32xf32>,
    %181 = vector.extract_strided_slice %7 {offsets = [56, 0], sizes = [8, 96], strides = [1, 1]} : vector<64x96xf32> to vector<8x96xf32>
    %cst_39 = arith.constant dense<0.000000e+00> : vector<8x96xf32>
    %182 = tpu.matmul %179, %8, %cst_39 {dimension_numbers = #tpu.dot_dimension_numbers<[1], [0], [0], [1], [0, 0, 1, 1], [], []>} : vector<8x32xf32>, vector<32x96xf32>, vector<8x96xf32> -> vector<8x96xf32>
    %183 = vector.extract_strided_slice %181 {offsets = [0, 0], sizes = [8, 64], strides = [1, 1]} : vector<8x96xf32> to vector<8x64xf32>
    %184 = vector.extract_strided_slice %182 {offsets = [0, 0], sizes = [8, 64], strides = [1, 1]} : vector<8x96xf32> to vector<8x64xf32>
    %185 = arith.addf %183, %184 : vector<8x64xf32>
    %186 = arith.negf %185 : vector<8x64xf32>
    %187 = math.exp %186 : vector<8x64xf32>
    %cst_40 = arith.constant 1.000000e+00 : f32
    %188 = vector.broadcast %cst_40 : f32 to vector<8x64xf32>
    %189 = arith.addf %188, %187 : vector<8x64xf32>
    %190 = arith.divf %188, %189 : vector<8x64xf32>
    %191 = vector.extract_strided_slice %190 {offsets = [0, 0], sizes = [8, 32], strides = [1, 1]} : vector<8x64xf32> to vector<8x32xf32>
    %192 = vector.extract_strided_slice %190 {offsets = [0, 32], sizes = [8, 32], strides = [1, 1]} : vector<8x64xf32> to vector<8x32xf32>
    %193 = vector.extract_strided_slice %181 {offsets = [0, 64], sizes = [8, 32], strides = [1, 1]} : vector<8x96xf32> to vector<8x32xf32>
    %194 = vector.extract_strided_slice %182 {offsets = [0, 64], sizes = [8, 32], strides = [1, 1]} : vector<8x96xf32> to vector<8x32xf32>
    %195 = arith.addf %194, %11 : vector<8x32xf32>
    %196 = arith.mulf %191, %195 : vector<8x32xf32>
    %197 = arith.addf %193, %196 : vector<8x32xf32>
    %198 = math.tanh %197 : vector<8x32xf32>
    %cst_41 = arith.constant 1.000000e+00 : f32
    %199 = vector.broadcast %cst_41 : f32 to vector<8x32xf32>
    %200 = arith.subf %199, %192 : vector<8x32xf32>
    %201 = arith.mulf %200, %198 : vector<8x32xf32>
    %202 = arith.mulf %192, %179 : vector<8x32xf32>
    %203 = arith.addf %201, %202 : vector<8x32xf32>
    %c56 = arith.constant 56 : index
    %c0_42 = arith.constant 0 : index
    %204 = vector.load %arg16[%c56, %c0_42] : memref<64x32xf32, #tpu.memory_space<vmem>>, vector<8x32xf32>
    tpu.vector_store %arg16[%c56, %c0_42], %203 {strides = array<i32>} : memref<64x32xf32, #tpu.memory_space<vmem>>, vector<8x32xf32>,
    %c0_43 = arith.constant 0 : index
    %c0_44 = arith.constant 0 : index
    %205 = vector.load %arg14[%c0_43, %c0_44] : memref<8x32xf32, #tpu.memory_space<vmem>>, vector<8x32xf32>
    tpu.vector_store %arg14[%c0_43, %c0_44], %203 {strides = array<i32>} : memref<8x32xf32, #tpu.memory_space<vmem>>, vector<8x32xf32>,
    %c0_45 = arith.constant 0 : index
    %c0_46 = arith.constant 0 : index
    %206 = vector.load %arg16[%c0_45, %c0_46] : memref<64x32xf32, #tpu.memory_space<vmem>>, vector<64x32xf32>
    %c0_47 = arith.constant 0 : index
    %c0_48 = arith.constant 0 : index
    %207 = vector.load %arg7[%c0_47, %c0_48] : memref<32x48xf32, #tpu.memory_space<vmem>>, vector<32x48xf32>
    %cst_49 = arith.constant dense<0.000000e+00> : vector<64x48xf32>
    %208 = tpu.matmul %206, %207, %cst_49 {dimension_numbers = #tpu.dot_dimension_numbers<[1], [0], [0], [1], [0, 0, 1, 1], [], []>} : vector<64x32xf32>, vector<32x48xf32>, vector<64x48xf32> -> vector<64x48xf32>
    %c0_50 = arith.constant 0 : index
    %c0_51 = arith.constant 0 : index
    %209 = vector.load %arg9[%c0_50, %c0_51] : memref<1x48xf32, #tpu.memory_space<vmem>>, vector<1x48xf32>
    %210 = vector.broadcast %209 : vector<1x48xf32> to vector<64x48xf32>
    %211 = arith.addf %208, %210 : vector<64x48xf32>
    %c0_52 = arith.constant 0 : index
    %c0_53 = arith.constant 0 : index
    %212 = vector.load %arg8[%c0_52, %c0_53] : memref<16x48xf32, #tpu.memory_space<vmem>>, vector<16x48xf32>
    %c0_54 = arith.constant 0 : index
    %c0_55 = arith.constant 0 : index
    %213 = vector.load %arg10[%c0_54, %c0_55] : memref<1x16xf32, #tpu.memory_space<vmem>>, vector<1x16xf32>
    %214 = vector.shape_cast %213 : vector<1x16xf32> to vector<1x16xf32>
    %215 = vector.broadcast %214 : vector<1x16xf32> to vector<8x16xf32>
    %c0_56 = arith.constant 0 : index
    %c0_57 = arith.constant 0 : index
    %216 = vector.load %arg6[%c0_56, %c0_57] : memref<8x16xf32, #tpu.memory_space<vmem>>, vector<8x16xf32>
    %217 = vector.extract_strided_slice %211 {offsets = [0, 0], sizes = [8, 48], strides = [1, 1]} : vector<64x48xf32> to vector<8x48xf32>
    %cst_58 = arith.constant dense<0.000000e+00> : vector<8x48xf32>
    %218 = tpu.matmul %216, %212, %cst_58 {dimension_numbers = #tpu.dot_dimension_numbers<[1], [0], [0], [1], [0, 0, 1, 1], [], []>} : vector<8x16xf32>, vector<16x48xf32>, vector<8x48xf32> -> vector<8x48xf32>
    %219 = vector.extract_strided_slice %217 {offsets = [0, 0], sizes = [8, 32], strides = [1, 1]} : vector<8x48xf32> to vector<8x32xf32>
    %220 = vector.extract_strided_slice %218 {offsets = [0, 0], sizes = [8, 32], strides = [1, 1]} : vector<8x48xf32> to vector<8x32xf32>
    %221 = arith.addf %219, %220 : vector<8x32xf32>
    %222 = arith.negf %221 : vector<8x32xf32>
    %223 = math.exp %222 : vector<8x32xf32>
    %cst_59 = arith.constant 1.000000e+00 : f32
    %224 = vector.broadcast %cst_59 : f32 to vector<8x32xf32>
    %225 = arith.addf %224, %223 : vector<8x32xf32>
    %226 = arith.divf %224, %225 : vector<8x32xf32>
    %227 = vector.extract_strided_slice %226 {offsets = [0, 0], sizes = [8, 16], strides = [1, 1]} : vector<8x32xf32> to vector<8x16xf32>
    %228 = vector.extract_strided_slice %226 {offsets = [0, 16], sizes = [8, 16], strides = [1, 1]} : vector<8x32xf32> to vector<8x16xf32>
    %229 = vector.extract_strided_slice %217 {offsets = [0, 32], sizes = [8, 16], strides = [1, 1]} : vector<8x48xf32> to vector<8x16xf32>
    %230 = vector.extract_strided_slice %218 {offsets = [0, 32], sizes = [8, 16], strides = [1, 1]} : vector<8x48xf32> to vector<8x16xf32>
    %231 = arith.addf %230, %215 : vector<8x16xf32>
    %232 = arith.mulf %227, %231 : vector<8x16xf32>
    %233 = arith.addf %229, %232 : vector<8x16xf32>
    %234 = math.tanh %233 : vector<8x16xf32>
    %cst_60 = arith.constant 1.000000e+00 : f32
    %235 = vector.broadcast %cst_60 : f32 to vector<8x16xf32>
    %236 = arith.subf %235, %228 : vector<8x16xf32>
    %237 = arith.mulf %236, %234 : vector<8x16xf32>
    %238 = arith.mulf %228, %216 : vector<8x16xf32>
    %239 = arith.addf %237, %238 : vector<8x16xf32>
    %240 = vector.extract_strided_slice %211 {offsets = [8, 0], sizes = [8, 48], strides = [1, 1]} : vector<64x48xf32> to vector<8x48xf32>
    %cst_61 = arith.constant dense<0.000000e+00> : vector<8x48xf32>
    %241 = tpu.matmul %239, %212, %cst_61 {dimension_numbers = #tpu.dot_dimension_numbers<[1], [0], [0], [1], [0, 0, 1, 1], [], []>} : vector<8x16xf32>, vector<16x48xf32>, vector<8x48xf32> -> vector<8x48xf32>
    %242 = vector.extract_strided_slice %240 {offsets = [0, 0], sizes = [8, 32], strides = [1, 1]} : vector<8x48xf32> to vector<8x32xf32>
    %243 = vector.extract_strided_slice %241 {offsets = [0, 0], sizes = [8, 32], strides = [1, 1]} : vector<8x48xf32> to vector<8x32xf32>
    %244 = arith.addf %242, %243 : vector<8x32xf32>
    %245 = arith.negf %244 : vector<8x32xf32>
    %246 = math.exp %245 : vector<8x32xf32>
    %cst_62 = arith.constant 1.000000e+00 : f32
    %247 = vector.broadcast %cst_62 : f32 to vector<8x32xf32>
    %248 = arith.addf %247, %246 : vector<8x32xf32>
    %249 = arith.divf %247, %248 : vector<8x32xf32>
    %250 = vector.extract_strided_slice %249 {offsets = [0, 0], sizes = [8, 16], strides = [1, 1]} : vector<8x32xf32> to vector<8x16xf32>
    %251 = vector.extract_strided_slice %249 {offsets = [0, 16], sizes = [8, 16], strides = [1, 1]} : vector<8x32xf32> to vector<8x16xf32>
    %252 = vector.extract_strided_slice %240 {offsets = [0, 32], sizes = [8, 16], strides = [1, 1]} : vector<8x48xf32> to vector<8x16xf32>
    %253 = vector.extract_strided_slice %241 {offsets = [0, 32], sizes = [8, 16], strides = [1, 1]} : vector<8x48xf32> to vector<8x16xf32>
    %254 = arith.addf %253, %215 : vector<8x16xf32>
    %255 = arith.mulf %250, %254 : vector<8x16xf32>
    %256 = arith.addf %252, %255 : vector<8x16xf32>
    %257 = math.tanh %256 : vector<8x16xf32>
    %cst_63 = arith.constant 1.000000e+00 : f32
    %258 = vector.broadcast %cst_63 : f32 to vector<8x16xf32>
    %259 = arith.subf %258, %251 : vector<8x16xf32>
    %260 = arith.mulf %259, %257 : vector<8x16xf32>
    %261 = arith.mulf %251, %239 : vector<8x16xf32>
    %262 = arith.addf %260, %261 : vector<8x16xf32>
    %263 = vector.extract_strided_slice %211 {offsets = [16, 0], sizes = [8, 48], strides = [1, 1]} : vector<64x48xf32> to vector<8x48xf32>
    %cst_64 = arith.constant dense<0.000000e+00> : vector<8x48xf32>
    %264 = tpu.matmul %262, %212, %cst_64 {dimension_numbers = #tpu.dot_dimension_numbers<[1], [0], [0], [1], [0, 0, 1, 1], [], []>} : vector<8x16xf32>, vector<16x48xf32>, vector<8x48xf32> -> vector<8x48xf32>
    %265 = vector.extract_strided_slice %263 {offsets = [0, 0], sizes = [8, 32], strides = [1, 1]} : vector<8x48xf32> to vector<8x32xf32>
    %266 = vector.extract_strided_slice %264 {offsets = [0, 0], sizes = [8, 32], strides = [1, 1]} : vector<8x48xf32> to vector<8x32xf32>
    %267 = arith.addf %265, %266 : vector<8x32xf32>
    %268 = arith.negf %267 : vector<8x32xf32>
    %269 = math.exp %268 : vector<8x32xf32>
    %cst_65 = arith.constant 1.000000e+00 : f32
    %270 = vector.broadcast %cst_65 : f32 to vector<8x32xf32>
    %271 = arith.addf %270, %269 : vector<8x32xf32>
    %272 = arith.divf %270, %271 : vector<8x32xf32>
    %273 = vector.extract_strided_slice %272 {offsets = [0, 0], sizes = [8, 16], strides = [1, 1]} : vector<8x32xf32> to vector<8x16xf32>
    %274 = vector.extract_strided_slice %272 {offsets = [0, 16], sizes = [8, 16], strides = [1, 1]} : vector<8x32xf32> to vector<8x16xf32>
    %275 = vector.extract_strided_slice %263 {offsets = [0, 32], sizes = [8, 16], strides = [1, 1]} : vector<8x48xf32> to vector<8x16xf32>
    %276 = vector.extract_strided_slice %264 {offsets = [0, 32], sizes = [8, 16], strides = [1, 1]} : vector<8x48xf32> to vector<8x16xf32>
    %277 = arith.addf %276, %215 : vector<8x16xf32>
    %278 = arith.mulf %273, %277 : vector<8x16xf32>
    %279 = arith.addf %275, %278 : vector<8x16xf32>
    %280 = math.tanh %279 : vector<8x16xf32>
    %cst_66 = arith.constant 1.000000e+00 : f32
    %281 = vector.broadcast %cst_66 : f32 to vector<8x16xf32>
    %282 = arith.subf %281, %274 : vector<8x16xf32>
    %283 = arith.mulf %282, %280 : vector<8x16xf32>
    %284 = arith.mulf %274, %262 : vector<8x16xf32>
    %285 = arith.addf %283, %284 : vector<8x16xf32>
    %286 = vector.extract_strided_slice %211 {offsets = [24, 0], sizes = [8, 48], strides = [1, 1]} : vector<64x48xf32> to vector<8x48xf32>
    %cst_67 = arith.constant dense<0.000000e+00> : vector<8x48xf32>
    %287 = tpu.matmul %285, %212, %cst_67 {dimension_numbers = #tpu.dot_dimension_numbers<[1], [0], [0], [1], [0, 0, 1, 1], [], []>} : vector<8x16xf32>, vector<16x48xf32>, vector<8x48xf32> -> vector<8x48xf32>
    %288 = vector.extract_strided_slice %286 {offsets = [0, 0], sizes = [8, 32], strides = [1, 1]} : vector<8x48xf32> to vector<8x32xf32>
    %289 = vector.extract_strided_slice %287 {offsets = [0, 0], sizes = [8, 32], strides = [1, 1]} : vector<8x48xf32> to vector<8x32xf32>
    %290 = arith.addf %288, %289 : vector<8x32xf32>
    %291 = arith.negf %290 : vector<8x32xf32>
    %292 = math.exp %291 : vector<8x32xf32>
    %cst_68 = arith.constant 1.000000e+00 : f32
    %293 = vector.broadcast %cst_68 : f32 to vector<8x32xf32>
    %294 = arith.addf %293, %292 : vector<8x32xf32>
    %295 = arith.divf %293, %294 : vector<8x32xf32>
    %296 = vector.extract_strided_slice %295 {offsets = [0, 0], sizes = [8, 16], strides = [1, 1]} : vector<8x32xf32> to vector<8x16xf32>
    %297 = vector.extract_strided_slice %295 {offsets = [0, 16], sizes = [8, 16], strides = [1, 1]} : vector<8x32xf32> to vector<8x16xf32>
    %298 = vector.extract_strided_slice %286 {offsets = [0, 32], sizes = [8, 16], strides = [1, 1]} : vector<8x48xf32> to vector<8x16xf32>
    %299 = vector.extract_strided_slice %287 {offsets = [0, 32], sizes = [8, 16], strides = [1, 1]} : vector<8x48xf32> to vector<8x16xf32>
    %300 = arith.addf %299, %215 : vector<8x16xf32>
    %301 = arith.mulf %296, %300 : vector<8x16xf32>
    %302 = arith.addf %298, %301 : vector<8x16xf32>
    %303 = math.tanh %302 : vector<8x16xf32>
    %cst_69 = arith.constant 1.000000e+00 : f32
    %304 = vector.broadcast %cst_69 : f32 to vector<8x16xf32>
    %305 = arith.subf %304, %297 : vector<8x16xf32>
    %306 = arith.mulf %305, %303 : vector<8x16xf32>
    %307 = arith.mulf %297, %285 : vector<8x16xf32>
    %308 = arith.addf %306, %307 : vector<8x16xf32>
    %309 = vector.extract_strided_slice %211 {offsets = [32, 0], sizes = [8, 48], strides = [1, 1]} : vector<64x48xf32> to vector<8x48xf32>
    %cst_70 = arith.constant dense<0.000000e+00> : vector<8x48xf32>
    %310 = tpu.matmul %308, %212, %cst_70 {dimension_numbers = #tpu.dot_dimension_numbers<[1], [0], [0], [1], [0, 0, 1, 1], [], []>} : vector<8x16xf32>, vector<16x48xf32>, vector<8x48xf32> -> vector<8x48xf32>
    %311 = vector.extract_strided_slice %309 {offsets = [0, 0], sizes = [8, 32], strides = [1, 1]} : vector<8x48xf32> to vector<8x32xf32>
    %312 = vector.extract_strided_slice %310 {offsets = [0, 0], sizes = [8, 32], strides = [1, 1]} : vector<8x48xf32> to vector<8x32xf32>
    %313 = arith.addf %311, %312 : vector<8x32xf32>
    %314 = arith.negf %313 : vector<8x32xf32>
    %315 = math.exp %314 : vector<8x32xf32>
    %cst_71 = arith.constant 1.000000e+00 : f32
    %316 = vector.broadcast %cst_71 : f32 to vector<8x32xf32>
    %317 = arith.addf %316, %315 : vector<8x32xf32>
    %318 = arith.divf %316, %317 : vector<8x32xf32>
    %319 = vector.extract_strided_slice %318 {offsets = [0, 0], sizes = [8, 16], strides = [1, 1]} : vector<8x32xf32> to vector<8x16xf32>
    %320 = vector.extract_strided_slice %318 {offsets = [0, 16], sizes = [8, 16], strides = [1, 1]} : vector<8x32xf32> to vector<8x16xf32>
    %321 = vector.extract_strided_slice %309 {offsets = [0, 32], sizes = [8, 16], strides = [1, 1]} : vector<8x48xf32> to vector<8x16xf32>
    %322 = vector.extract_strided_slice %310 {offsets = [0, 32], sizes = [8, 16], strides = [1, 1]} : vector<8x48xf32> to vector<8x16xf32>
    %323 = arith.addf %322, %215 : vector<8x16xf32>
    %324 = arith.mulf %319, %323 : vector<8x16xf32>
    %325 = arith.addf %321, %324 : vector<8x16xf32>
    %326 = math.tanh %325 : vector<8x16xf32>
    %cst_72 = arith.constant 1.000000e+00 : f32
    %327 = vector.broadcast %cst_72 : f32 to vector<8x16xf32>
    %328 = arith.subf %327, %320 : vector<8x16xf32>
    %329 = arith.mulf %328, %326 : vector<8x16xf32>
    %330 = arith.mulf %320, %308 : vector<8x16xf32>
    %331 = arith.addf %329, %330 : vector<8x16xf32>
    %332 = vector.extract_strided_slice %211 {offsets = [40, 0], sizes = [8, 48], strides = [1, 1]} : vector<64x48xf32> to vector<8x48xf32>
    %cst_73 = arith.constant dense<0.000000e+00> : vector<8x48xf32>
    %333 = tpu.matmul %331, %212, %cst_73 {dimension_numbers = #tpu.dot_dimension_numbers<[1], [0], [0], [1], [0, 0, 1, 1], [], []>} : vector<8x16xf32>, vector<16x48xf32>, vector<8x48xf32> -> vector<8x48xf32>
    %334 = vector.extract_strided_slice %332 {offsets = [0, 0], sizes = [8, 32], strides = [1, 1]} : vector<8x48xf32> to vector<8x32xf32>
    %335 = vector.extract_strided_slice %333 {offsets = [0, 0], sizes = [8, 32], strides = [1, 1]} : vector<8x48xf32> to vector<8x32xf32>
    %336 = arith.addf %334, %335 : vector<8x32xf32>
    %337 = arith.negf %336 : vector<8x32xf32>
    %338 = math.exp %337 : vector<8x32xf32>
    %cst_74 = arith.constant 1.000000e+00 : f32
    %339 = vector.broadcast %cst_74 : f32 to vector<8x32xf32>
    %340 = arith.addf %339, %338 : vector<8x32xf32>
    %341 = arith.divf %339, %340 : vector<8x32xf32>
    %342 = vector.extract_strided_slice %341 {offsets = [0, 0], sizes = [8, 16], strides = [1, 1]} : vector<8x32xf32> to vector<8x16xf32>
    %343 = vector.extract_strided_slice %341 {offsets = [0, 16], sizes = [8, 16], strides = [1, 1]} : vector<8x32xf32> to vector<8x16xf32>
    %344 = vector.extract_strided_slice %332 {offsets = [0, 32], sizes = [8, 16], strides = [1, 1]} : vector<8x48xf32> to vector<8x16xf32>
    %345 = vector.extract_strided_slice %333 {offsets = [0, 32], sizes = [8, 16], strides = [1, 1]} : vector<8x48xf32> to vector<8x16xf32>
    %346 = arith.addf %345, %215 : vector<8x16xf32>
    %347 = arith.mulf %342, %346 : vector<8x16xf32>
    %348 = arith.addf %344, %347 : vector<8x16xf32>
    %349 = math.tanh %348 : vector<8x16xf32>
    %cst_75 = arith.constant 1.000000e+00 : f32
    %350 = vector.broadcast %cst_75 : f32 to vector<8x16xf32>
    %351 = arith.subf %350, %343 : vector<8x16xf32>
    %352 = arith.mulf %351, %349 : vector<8x16xf32>
    %353 = arith.mulf %343, %331 : vector<8x16xf32>
    %354 = arith.addf %352, %353 : vector<8x16xf32>
    %355 = vector.extract_strided_slice %211 {offsets = [48, 0], sizes = [8, 48], strides = [1, 1]} : vector<64x48xf32> to vector<8x48xf32>
    %cst_76 = arith.constant dense<0.000000e+00> : vector<8x48xf32>
    %356 = tpu.matmul %354, %212, %cst_76 {dimension_numbers = #tpu.dot_dimension_numbers<[1], [0], [0], [1], [0, 0, 1, 1], [], []>} : vector<8x16xf32>, vector<16x48xf32>, vector<8x48xf32> -> vector<8x48xf32>
    %357 = vector.extract_strided_slice %355 {offsets = [0, 0], sizes = [8, 32], strides = [1, 1]} : vector<8x48xf32> to vector<8x32xf32>
    %358 = vector.extract_strided_slice %356 {offsets = [0, 0], sizes = [8, 32], strides = [1, 1]} : vector<8x48xf32> to vector<8x32xf32>
    %359 = arith.addf %357, %358 : vector<8x32xf32>
    %360 = arith.negf %359 : vector<8x32xf32>
    %361 = math.exp %360 : vector<8x32xf32>
    %cst_77 = arith.constant 1.000000e+00 : f32
    %362 = vector.broadcast %cst_77 : f32 to vector<8x32xf32>
    %363 = arith.addf %362, %361 : vector<8x32xf32>
    %364 = arith.divf %362, %363 : vector<8x32xf32>
    %365 = vector.extract_strided_slice %364 {offsets = [0, 0], sizes = [8, 16], strides = [1, 1]} : vector<8x32xf32> to vector<8x16xf32>
    %366 = vector.extract_strided_slice %364 {offsets = [0, 16], sizes = [8, 16], strides = [1, 1]} : vector<8x32xf32> to vector<8x16xf32>
    %367 = vector.extract_strided_slice %355 {offsets = [0, 32], sizes = [8, 16], strides = [1, 1]} : vector<8x48xf32> to vector<8x16xf32>
    %368 = vector.extract_strided_slice %356 {offsets = [0, 32], sizes = [8, 16], strides = [1, 1]} : vector<8x48xf32> to vector<8x16xf32>
    %369 = arith.addf %368, %215 : vector<8x16xf32>
    %370 = arith.mulf %365, %369 : vector<8x16xf32>
    %371 = arith.addf %367, %370 : vector<8x16xf32>
    %372 = math.tanh %371 : vector<8x16xf32>
    %cst_78 = arith.constant 1.000000e+00 : f32
    %373 = vector.broadcast %cst_78 : f32 to vector<8x16xf32>
    %374 = arith.subf %373, %366 : vector<8x16xf32>
    %375 = arith.mulf %374, %372 : vector<8x16xf32>
    %376 = arith.mulf %366, %354 : vector<8x16xf32>
    %377 = arith.addf %375, %376 : vector<8x16xf32>
    %378 = vector.extract_strided_slice %211 {offsets = [56, 0], sizes = [8, 48], strides = [1, 1]} : vector<64x48xf32> to vector<8x48xf32>
    %cst_79 = arith.constant dense<0.000000e+00> : vector<8x48xf32>
    %379 = tpu.matmul %377, %212, %cst_79 {dimension_numbers = #tpu.dot_dimension_numbers<[1], [0], [0], [1], [0, 0, 1, 1], [], []>} : vector<8x16xf32>, vector<16x48xf32>, vector<8x48xf32> -> vector<8x48xf32>
    %380 = vector.extract_strided_slice %378 {offsets = [0, 0], sizes = [8, 32], strides = [1, 1]} : vector<8x48xf32> to vector<8x32xf32>
    %381 = vector.extract_strided_slice %379 {offsets = [0, 0], sizes = [8, 32], strides = [1, 1]} : vector<8x48xf32> to vector<8x32xf32>
    %382 = arith.addf %380, %381 : vector<8x32xf32>
    %383 = arith.negf %382 : vector<8x32xf32>
    %384 = math.exp %383 : vector<8x32xf32>
    %cst_80 = arith.constant 1.000000e+00 : f32
    %385 = vector.broadcast %cst_80 : f32 to vector<8x32xf32>
    %386 = arith.addf %385, %384 : vector<8x32xf32>
    %387 = arith.divf %385, %386 : vector<8x32xf32>
    %388 = vector.extract_strided_slice %387 {offsets = [0, 0], sizes = [8, 16], strides = [1, 1]} : vector<8x32xf32> to vector<8x16xf32>
    %389 = vector.extract_strided_slice %387 {offsets = [0, 16], sizes = [8, 16], strides = [1, 1]} : vector<8x32xf32> to vector<8x16xf32>
    %390 = vector.extract_strided_slice %378 {offsets = [0, 32], sizes = [8, 16], strides = [1, 1]} : vector<8x48xf32> to vector<8x16xf32>
    %391 = vector.extract_strided_slice %379 {offsets = [0, 32], sizes = [8, 16], strides = [1, 1]} : vector<8x48xf32> to vector<8x16xf32>
    %392 = arith.addf %391, %215 : vector<8x16xf32>
    %393 = arith.mulf %388, %392 : vector<8x16xf32>
    %394 = arith.addf %390, %393 : vector<8x16xf32>
    %395 = math.tanh %394 : vector<8x16xf32>
    %cst_81 = arith.constant 1.000000e+00 : f32
    %396 = vector.broadcast %cst_81 : f32 to vector<8x16xf32>
    %397 = arith.subf %396, %389 : vector<8x16xf32>
    %398 = arith.mulf %397, %395 : vector<8x16xf32>
    %399 = arith.mulf %389, %377 : vector<8x16xf32>
    %400 = arith.addf %398, %399 : vector<8x16xf32>
    %c0_82 = arith.constant 0 : index
    %c0_83 = arith.constant 0 : index
    %401 = vector.load %arg15[%c0_82, %c0_83] : memref<8x16xf32, #tpu.memory_space<vmem>>, vector<8x16xf32>
    tpu.vector_store %arg15[%c0_82, %c0_83], %400 {strides = array<i32>} : memref<8x16xf32, #tpu.memory_space<vmem>>, vector<8x16xf32>,
    %c0_84 = arith.constant 0 : index
    %c0_85 = arith.constant 0 : index
    %402 = vector.load %arg11[%c0_84, %c0_85] : memref<16x8xf32, #tpu.memory_space<vmem>>, vector<16x8xf32>
    %cst_86 = arith.constant dense<0.000000e+00> : vector<8x8xf32>
    %403 = tpu.matmul %400, %402, %cst_86 {dimension_numbers = #tpu.dot_dimension_numbers<[1], [0], [0], [1], [0, 0, 1, 1], [], []>} : vector<8x16xf32>, vector<16x8xf32>, vector<8x8xf32> -> vector<8x8xf32>
    %c0_87 = arith.constant 0 : index
    %c0_88 = arith.constant 0 : index
    %404 = vector.load %arg12[%c0_87, %c0_88] : memref<1x8xf32, #tpu.memory_space<vmem>>, vector<1x8xf32>
    %405 = vector.broadcast %404 : vector<1x8xf32> to vector<8x8xf32>
    %406 = arith.addf %403, %405 : vector<8x8xf32>
    %407 = math.tanh %406 : vector<8x8xf32>
    %c0_89 = arith.constant 0 : index
    %c0_90 = arith.constant 0 : index
    %408 = vector.load %arg13[%c0_89, %c0_90] : memref<8x8xf32, #tpu.memory_space<vmem>>, vector<8x8xf32>
    tpu.vector_store %arg13[%c0_89, %c0_90], %407 {strides = array<i32>} : memref<8x8xf32, #tpu.memory_space<vmem>>, vector<8x8xf32>,
    return
  }
}

</mosaic_0001>

<bundles_post_ra>
// kernel: _forward.1
= control target key start
LH: loop header
LB: loop body
LE: loop exit
PB: predicated region body
PF: predicated region fallthrough
CT: control target
= control target key end

     0   :  { %v1490_v2 = vmov 0   ;;  %s1491_s28 = smov 64   ;;  %vm127_vm0 = vcmask 261120   ;;  %s1898_s3 = inlined_call_operand.vmem [shape: f32[32,96], index: 3, kind: input, shape index: {}]   ;;  %s1899_s5 = inlined_call_operand.vmem [shape: f32[1,32], index: 5, kind: input, shape index: {}]   ;;  %s1900_s2 = inlined_call_operand.vmem [shape: f32[1,96], index: 2, kind: input, shape index: {}]   ;;  %s1901_s1 = inlined_call_operand.vmem [shape: f32[8,32], index: 1, kind: input, shape index: {}]   ;;  %s1902_s4 = inlined_call_operand.vmem [shape: f32[1,96], index: 4, kind: input, shape index: {}]   ;;  %s1903_s0 = inlined_call_operand.vmem [shape: f32[64,1], index: 0, kind: input, shape index: {}]   ;;  %s1904_s7 = inlined_call_operand.vmem [shape: f32[32,48], index: 7, kind: input, shape index: {}]   ;;  %s1905_s9 = inlined_call_operand.vmem [shape: f32[1,48], index: 9, kind: input, shape index: {}]   ;;  %s1906_s8 = inlined_call_operand.vmem [shape: f32[16,48], index: 8, kind: input, shape index: {}]   ;;  %s1907_s10 = inlined_call_operand.vmem [shape: f32[1,16], index: 10, kind: input, shape index: {}]   ;;  %s1908_s14 = inlined_call_operand.vmem [shape: f32[8,32], index: 14, kind: output, shape index: {1}]   ;;  %s1909_s6 = inlined_call_operand.vmem [shape: f32[8,16], index: 6, kind: input, shape index: {}]   ;;  %s1910_s11 = inlined_call_operand.vmem [shape: f32[16,8], index: 11, kind: input, shape index: {}]   ;;  %s1911_s12 = inlined_call_operand.vmem [shape: f32[1,8], index: 12, kind: input, shape index: {}]   ;;  %s1912_s15 = inlined_call_operand.vmem [shape: f32[8,16], index: 15, kind: output, shape index: {2}]   ;;  %s1913_s13 = inlined_call_operand.vmem [shape: f32[8,8], index: 13, kind: output, shape index: {0}]  }
   0x1   :  { %v1579_v0 = vld [vmem:[%s1898_s3 + $0x18] sm:$0xff]  ;;  %v1584_v1 = vld [vmem:[%s1898_s3 + $0x10] sm:$0xff]  ;;  %1383 = vset.pattern.permute.xlu0 %v1490_v2  ;;  %1384 = vset.pattern.permute.xlu2 %v1490_v2  ;;  %v1591_v3 = vld [vmem:[%s1898_s3 + $0x8] sm:$0xff] }
   0x2   :  { %143 = vmatpush.msra.mxu3 %v1579_v0  ;;  %216 = vmatpush.msra.mxu2 %v1579_v0  ;;  %v1386_v4 = vld [vmem:[%s1899_s5] ss:$0 sm:$0xff]  ;;  %v48_v41 = vld [vmem:[%s1903_s0 + $0x8] sm:$0xff] }
   0x3   :  { %1385 = vset.pattern.permute.xlu1 %v1490_v2  ;;  %417 = vmatpush.msra.mxu0 %v1579_v0  ;;  %v1602_v5 = vld [vmem:[%s1898_s3] sm:$0xff] }
   0x4   :  { %144 = vmatpush.msra.mxu3 %v1584_v1  ;;  %217 = vmatpush.msra.mxu2 %v1584_v1  ;;  %v1610_v6 = vld [vmem:[%s1901_s1] sm:$0xff] }
   0x5   :  { %171 = vrot.lane.b32.xlu0 %v1386_v4, %s1491_s28  ;;  %418 = vmatpush.msra.mxu0 %v1584_v1  ;;  %v47_v7 = vld [vmem:[%s1903_s0] sm:$0xff] }
   0x6   :  { %145 = vmatpush.msra.mxu3 %v1591_v3  ;;  %218 = vmatpush.msra.mxu2 %v1591_v3  ;;  %v1645_v11 = vld [vmem:[%s1900_s2] ss:$0 sm:$0xff]  ;;  %s1492_s2 = smov 96  }
   0x7   :  { %419 = vmatpush.msra.mxu0 %v1591_v3  ;;  %484 = vmatpush.msra.mxu1 %v1579_v0  ;;  %v1650_v13 = vld [vmem:[%s1902_s4] ss:$0 sm:$0xff]  ;;  %s1493_s4 = smov 32  }
   0x8   :  { %146 = vmatpush.msra.mxu3 %v1602_v5  ;;  %219 = vmatpush.msra.mxu2 %v1602_v5 }
   0x9   :  { %1332 = vmatmul.msk.f32.vlgmr.msra.gmra.mxu3 %vm127_vm0, %v1610_v6  ;;  %420 = vmatpush.msra.mxu0 %v1602_v5 }
   0xa   :  { %283 = vmatpush.msrb.mxu2 %v1579_v0  ;;  %350 = vmatpush.msrb.mxu3 %v1579_v0 }
   0xb   :  { %485 = vmatpush.msra.mxu1 %v1584_v1 }
   0xc   :  { %284 = vmatpush.msrb.mxu2 %v1584_v1  ;;  %351 = vmatpush.msrb.mxu3 %v1584_v1 }
   0xd   :  { %58 = vperm.xlu0 %1383, %v47_v7   ;;  %486 = vmatpush.msra.mxu1 %v1591_v3 }
   0xe   :  { %285 = vmatpush.msrb.mxu2 %v1591_v3  ;;  %352 = vmatpush.msrb.mxu3 %v1591_v3 }
   0xf   :  { %487 = vmatpush.msra.mxu1 %v1602_v5 }
  0x10   :  { %286 = vmatpush.msrb.mxu2 %v1602_v5  ;;  %353 = vmatpush.msrb.mxu3 %v1602_v5 }
  0x12   :  { %618 = vmatpush.msra.mxu3 %v1579_v0 }
  0x14   :  { %619 = vmatpush.msra.mxu3 %v1584_v1 }
  0x16   :  { %620 = vmatpush.msra.mxu3 %v1591_v3 }
  0x18   :  { %621 = vmatpush.msra.mxu3 %v1602_v5 }
  0x77   :  { %v1638_v8 = vpop.permute.xlu0 %171 }
  0x7f   :  { %v59_v12 = vpop.permute.xlu0 %58 }
  0x80   :  { %v99_v14 = vmul.f32 %v1645_v11, %v59_v12 }
  0x82   :  { %v111_v15 = vadd.f32 %v1650_v13, %v99_v14 }
  0x8c   :  { %v148_v9 = vpop.f32.mrf.mxu3 }
  0x8d   :  { %v174_v10 = vadd.f32 %v1638_v8, %v148_v9  ;;  %v151_v16 = vadd.f32 %v148_v9, %v111_v15  ;;  %v49_v9 = vld [vmem:[%s1903_s0 + $0x10] sm:$0xff] }
  0x8f   :  { %176 = vrot.lane.b32.xlu1 %v174_v10, %s1491_s28  ;;  %v1333_v17 = vmul.f32 -1.442695, %v151_v16 }
  0x91   :  { %1392 = vpow2.f32 %v1333_v17 }
  0x97   :  { %v1393_v18 = vpop.eup %1392 }
  0x98   :  { %v155_v19 = vadd.f32 1.0, %v1393_v18 }
  0x9a   :  { %1394 = vrcp.f32 %v155_v19  ;;  %v167_v25 = vand.u32 2147483648, %v155_v19  ;;  %vm161_vm2 = vweird.f32 %v155_v19  ;;  %v165_v26 = vand.u32 2147483647, %v155_v19 }
  0x9c   :  { %v168_v28 = vor.u32 1.1754944e-38, %v167_v25  ;;  %vm166_vm4 = vcmp.eq.f32.partialorder %v165_v26, 8.507059e+37 }
  0xa0   :  { %v1395_v20 = vpop.eup %1394 }
  0xa1   :  { %v157_v21 = vmul.f32 %v1395_v20, %v155_v19  ;;  %vm162_vm1 = vweird.f32 %v1395_v20 }
  0xa2   :  { %vm163_vm3 = vmor %vm161_vm2, %vm162_vm1 }
  0xa3   :  { %v158_v22 = vsub.f32 1.0, %v157_v21 }
  0xa5   :  { %v159_v23 = vmul.f32 %v1395_v20, %v158_v22 }
  0xa7   :  { %v160_v24 = vadd.f32 %v1395_v20, %v159_v23 }
  0xa9   :  { %v164_v27 = vsel %vm163_vm3, %v1395_v20, %v160_v24 }
  0xaa   :  { %v169_v30 = vsel %vm166_vm4, %v168_v28, %v164_v27 }
  0xab   :  { %v186_v36 = vsub.f32 1.0, %v169_v30 }
 0x101   :  { %v177_v29 = vpop.permute.xlu1 %176 }
 0x102   :  { %v179_v31 = vmul.f32 %v177_v29, %v169_v30 }
 0x104   :  { %181 = vrot.lane.b32.xlu1 %v179_v31, %s1491_s28 }
 0x176   :  { %v182_v32 = vpop.permute.xlu1 %181 }
 0x177   :  { %v184_v33 = vadd.f32 %v182_v32, %v111_v15 }
 0x179   :  { %1396 = vtanh.f32 %v184_v33 }
 0x17f   :  { %v1397_v34 = vpop.eup %1396 }
 0x180   :  { %188 = vrot.lane.b32.xlu2 %v1397_v34, %s1492_s2  ;;  %v50_v34 = vld [vmem:[%s1903_s0 + $0x18] sm:$0xff] }
 0x188   :  { %192 = vrot.lane.b32.xlu2 %v1610_v6, %s1493_s4 }
 0x190   :  { %63 = vperm.xlu2 %1384, %v48_v41  }
 0x1da   :  { %v189_v35 = vpop.permute.xlu2 %188 }
 0x1db   :  { %v191_v38 = vmul.f32 %v189_v35, %v186_v36 }
 0x1e2   :  { %v193_v37 = vpop.permute.xlu2 %192 }
 0x1e3   :  { %v195_v39 = vmul.f32 %v193_v37, %v169_v30 }
 0x1e5   :  { %v196_v40 = vadd.f32 %v195_v39, %v191_v38 }
 0x1e7   :  { %198 = vrot.lane.b32.xlu1 %v196_v40, %s1492_s2 }
 0x1ea   :  { %v64_v45 = vpop.permute.xlu2 %63 }
 0x1eb   :  { %v100_v46 = vmul.f32 %v1645_v11, %v64_v45 }
 0x1ed   :  { %v112_v47 = vadd.f32 %v1650_v13, %v100_v46 }
 0x259   :  { %v199_v42 = vpop.permute.xlu1 %198 }
 0x25a   :  { %201 = vst.msk [vmem:[#allocation2] sm:$0xff] %vm127_vm0, %v199_v42  ;;  %1334 = vmatmul.msk.f32.vlgmr.msra.gmra.mxu2 %vm127_vm0, %v199_v42 }
 0x25b   :  { %551 = vmatpush.msra.mxu2 %v1579_v0 }
 0x25d   :  { %552 = vmatpush.msra.mxu2 %v1584_v1 }
 0x25f   :  { %553 = vmatpush.msra.mxu2 %v1591_v3 }
 0x261   :  { %554 = vmatpush.msra.mxu2 %v1602_v5 }
 0x2dd   :  { %v221_v43 = vpop.f32.mrf.mxu2 }
 0x2de   :  { %v244_v44 = vadd.f32 %v221_v43, %v1638_v8  ;;  %v224_v48 = vadd.f32 %v221_v43, %v112_v47 }
 0x2e0   :  { %246 = vrot.lane.b32.xlu0 %v244_v44, %s1491_s28  ;;  %v1335_v49 = vmul.f32 -1.442695, %v224_v48 }
 0x2e2   :  { %1398 = vpow2.f32 %v1335_v49 }
 0x2e8   :  { %v1399_v50 = vpop.eup %1398 }
 0x2e9   :  { %v228_v51 = vadd.f32 1.0, %v1399_v50 }
 0x2eb   :  { %1400 = vrcp.f32 %v228_v51  ;;  %v240_v57 = vand.u32 2147483648, %v228_v51  ;;  %vm234_vm6 = vweird.f32 %v228_v51  ;;  %v238_v58 = vand.u32 2147483647, %v228_v51 }
 0x2ed   :  { %v241_v60 = vor.u32 1.1754944e-38, %v240_v57  ;;  %vm239_vm8 = vcmp.eq.f32.partialorder %v238_v58, 8.507059e+37 }
 0x2f1   :  { %v1401_v52 = vpop.eup %1400 }
 0x2f2   :  { %v230_v53 = vmul.f32 %v1401_v52, %v228_v51  ;;  %vm235_vm5 = vweird.f32 %v1401_v52 }
 0x2f3   :  { %vm236_vm7 = vmor %vm234_vm6, %vm235_vm5 }
 0x2f4   :  { %v231_v54 = vsub.f32 1.0, %v230_v53 }
 0x2f6   :  { %v232_v55 = vmul.f32 %v1401_v52, %v231_v54 }
 0x2f8   :  { %v233_v56 = vadd.f32 %v1401_v52, %v232_v55 }
 0x2fa   :  { %v237_v59 = vsel %vm236_vm7, %v1401_v52, %v233_v56 }
 0x2fb   :  { %v242_v62 = vsel %vm239_vm8, %v241_v60, %v237_v59 }
 0x2fc   :  { %v256_v3 = vsub.f32 1.0, %v242_v62  ;;  %v262_v5 = vmul.f32 %v242_v62, %v196_v40 }
 0x352   :  { %v247_v61 = vpop.permute.xlu0 %246 }
 0x353   :  { %v249_v63 = vmul.f32 %v247_v61, %v242_v62 }
 0x355   :  { %251 = vrot.lane.b32.xlu1 %v249_v63, %s1491_s28 }
 0x35d   :  { %68 = vperm.xlu1 %1385, %v49_v9  }
 0x3c7   :  { %v252_v0 = vpop.permute.xlu1 %251 }
 0x3c8   :  { %v254_v1 = vadd.f32 %v252_v0, %v112_v47 }
 0x3ca   :  { %1402 = vtanh.f32 %v254_v1  ;;  %v51_v1 = vld [vmem:[%s1903_s0 + $0x20] sm:$0xff] }
 0x3cf   :  { %v69_v15 = vpop.permute.xlu1 %68 }
 0x3d0   :  { %v1403_v2 = vpop.eup %1402  ;;  %v101_v16 = vmul.f32 %v1645_v11, %v69_v15  ;;  %v681_v15 = vld [vmem:[%s1904_s7 + $0x8] sm:$0xff] }
 0x3d1   :  { %258 = vrot.lane.b32.xlu2 %v1403_v2, %s1492_s2 }
 0x3d2   :  { %v113_v17 = vadd.f32 %v1650_v13, %v101_v16  ;;  %v680_v16 = vld [vmem:[%s1904_s7] sm:$0xff] }
 0x42b   :  { %v259_v4 = vpop.permute.xlu2 %258 }
 0x42c   :  { %v261_v6 = vmul.f32 %v259_v4, %v256_v3 }
 0x42e   :  { %v263_v7 = vadd.f32 %v262_v5, %v261_v6 }
 0x430   :  { %265 = vrot.lane.b32.xlu0 %v263_v7, %s1492_s2 }
 0x4a2   :  { %v266_v10 = vpop.permute.xlu0 %265 }
 0x4a3   :  { %268 = vst.msk [vmem:[#allocation2 + $0x8] sm:$0xff] %vm127_vm0, %v266_v10  ;;  %1336 = vmatmul.msk.f32.vlgmr.msrb.gmra.mxu2 %vm127_vm0, %v266_v10 }
 0x526   :  { %v288_v12 = vpop.f32.mrf.mxu2 }
 0x527   :  { %v311_v14 = vadd.f32 %v288_v12, %v1638_v8  ;;  %v291_v18 = vadd.f32 %v288_v12, %v113_v17  ;;  %v683_v12 = vld [vmem:[%s1904_s7 + $0x18] sm:$0xff] }
 0x528   :  { %724 = vmatpush.msrb.mxu0 %v683_v12  ;;  %1373 = vmatpush.msrb.mxu1 %v683_v12 }
 0x529   :  { %313 = vrot.lane.b32.xlu2 %v311_v14, %s1491_s28  ;;  %v1337_v19 = vmul.f32 -1.442695, %v291_v18  ;;  %v682_v14 = vld [vmem:[%s1904_s7 + $0x10] sm:$0xff]  ;;  %v672_v18 = vld [vmem:[#allocation2] sm:$0xff] }
 0x52a   :  { %725 = vmatpush.msrb.mxu0 %v682_v14  ;;  %1374 = vmatpush.msrb.mxu1 %v682_v14  ;;  %v53_v14 = vld [vmem:[%s1903_s0 + $0x30] sm:$0xff] }
 0x52b   :  { %1404 = vpow2.f32 %v1337_v19  ;;  %v673_v19 = vld [vmem:[#allocation2 + $0x8] sm:$0xff] }
 0x52c   :  { %726 = vmatpush.msrb.mxu0 %v681_v15  ;;  %1375 = vmatpush.msrb.mxu1 %v681_v15 }
 0x52e   :  { %727 = vmatpush.msrb.mxu0 %v680_v16  ;;  %1376 = vmatpush.msrb.mxu1 %v680_v16 }
 0x531   :  { %v1405_v20 = vpop.eup %1404 }
 0x532   :  { %v295_v21 = vadd.f32 1.0, %v1405_v20 }
 0x534   :  { %1406 = vrcp.f32 %v295_v21  ;;  %v307_v27 = vand.u32 2147483648, %v295_v21  ;;  %vm301_vm10 = vweird.f32 %v295_v21  ;;  %v305_v28 = vand.u32 2147483647, %v295_v21 }
 0x536   :  { %v308_v30 = vor.u32 1.1754944e-38, %v307_v27  ;;  %vm306_vm12 = vcmp.eq.f32.partialorder %v305_v28, 8.507059e+37 }
 0x53a   :  { %v1407_v22 = vpop.eup %1406 }
 0x53b   :  { %v297_v23 = vmul.f32 %v1407_v22, %v295_v21  ;;  %vm302_vm9 = vweird.f32 %v1407_v22 }
 0x53c   :  { %vm303_vm11 = vmor %vm301_vm10, %vm302_vm9 }
 0x53d   :  { %v298_v24 = vsub.f32 1.0, %v297_v23 }
 0x53f   :  { %v299_v25 = vmul.f32 %v1407_v22, %v298_v24 }
 0x541   :  { %v300_v26 = vadd.f32 %v1407_v22, %v299_v25 }
 0x543   :  { %v304_v29 = vsel %vm303_vm11, %v1407_v22, %v300_v26 }
 0x544   :  { %v309_v32 = vsel %vm306_vm12, %v308_v30, %v304_v29 }
 0x545   :  { %v323_v38 = vsub.f32 1.0, %v309_v32  ;;  %v329_v40 = vmul.f32 %v309_v32, %v263_v7 }
 0x583   :  { %v314_v31 = vpop.permute.xlu2 %313 }
 0x584   :  { %v316_v33 = vmul.f32 %v314_v31, %v309_v32 }
 0x586   :  { %318 = vrot.lane.b32.xlu0 %v316_v33, %s1491_s28 }
 0x58e   :  { %73 = vperm.xlu0 %1383, %v50_v34  }
 0x5f8   :  { %v319_v35 = vpop.permute.xlu0 %318 }
 0x5f9   :  { %v321_v36 = vadd.f32 %v319_v35, %v113_v17 }
 0x5fb   :  { %1408 = vtanh.f32 %v321_v36 }
 0x600   :  { %v74_v46 = vpop.permute.xlu0 %73 }
 0x601   :  { %v1409_v37 = vpop.eup %1408  ;;  %v102_v47 = vmul.f32 %v1645_v11, %v74_v46 }
 0x602   :  { %325 = vrot.lane.b32.xlu1 %v1409_v37, %s1492_s2 }
 0x603   :  { %v114_v48 = vadd.f32 %v1650_v13, %v102_v47 }
 0x674   :  { %v326_v39 = vpop.permute.xlu1 %325 }
 0x675   :  { %v328_v41 = vmul.f32 %v326_v39, %v323_v38 }
 0x677   :  { %v330_v42 = vadd.f32 %v329_v40, %v328_v41 }
 0x679   :  { %332 = vrot.lane.b32.xlu2 %v330_v42, %s1492_s2 }
 0x6d3   :  { %v333_v43 = vpop.permute.xlu2 %332 }
 0x6d4   :  { %335 = vst.msk [vmem:[#allocation2 + $0x10] sm:$0xff] %vm127_vm0, %v333_v43  ;;  %1338 = vmatmul.msk.f32.vlgmr.msrb.gmra.mxu3 %vm127_vm0, %v333_v43  ;;  %v52_v43 = vld [vmem:[%s1903_s0 + $0x28] sm:$0xff] }
 0x6db   :  { %v674_v20 = vld [vmem:[#allocation2 + $0x10] sm:$0xff] }
 0x757   :  { %v355_v44 = vpop.f32.mrf.mxu3 }
 0x758   :  { %v378_v45 = vadd.f32 %v355_v44, %v1638_v8  ;;  %v358_v49 = vadd.f32 %v355_v44, %v114_v48 }
 0x75a   :  { %380 = vrot.lane.b32.xlu1 %v378_v45, %s1491_s28  ;;  %v1339_v50 = vmul.f32 -1.442695, %v358_v49 }
 0x75c   :  { %1410 = vpow2.f32 %v1339_v50 }
 0x762   :  { %v1411_v51 = vpop.eup %1410 }
 0x763   :  { %v362_v52 = vadd.f32 1.0, %v1411_v51 }
 0x765   :  { %1412 = vrcp.f32 %v362_v52  ;;  %v374_v58 = vand.u32 2147483648, %v362_v52  ;;  %vm368_vm14 = vweird.f32 %v362_v52  ;;  %v372_v59 = vand.u32 2147483647, %v362_v52 }
 0x767   :  { %v375_v61 = vor.u32 1.1754944e-38, %v374_v58  ;;  %vm373_vm1 = vcmp.eq.f32.partialorder %v372_v59, 8.507059e+37 }
 0x76b   :  { %v1413_v53 = vpop.eup %1412 }
 0x76c   :  { %v364_v54 = vmul.f32 %v1413_v53, %v362_v52  ;;  %vm369_vm13 = vweird.f32 %v1413_v53 }
 0x76d   :  { %vm370_vm15 = vmor %vm368_vm14, %vm369_vm13 }
 0x76e   :  { %v365_v55 = vsub.f32 1.0, %v364_v54 }
 0x770   :  { %v366_v56 = vmul.f32 %v1413_v53, %v365_v55 }
 0x772   :  { %v367_v57 = vadd.f32 %v1413_v53, %v366_v56 }
 0x774   :  { %v371_v60 = vsel %vm370_vm15, %v1413_v53, %v367_v57 }
 0x775   :  { %v376_v63 = vsel %vm373_vm1, %v375_v61, %v371_v60 }
 0x776   :  { %v390_v5 = vsub.f32 1.0, %v376_v63  ;;  %v396_v7 = vmul.f32 %v376_v63, %v330_v42 }
 0x7cc   :  { %v381_v62 = vpop.permute.xlu1 %380 }
 0x7cd   :  { %v383_v0 = vmul.f32 %v381_v62, %v376_v63 }
 0x7cf   :  { %385 = vrot.lane.b32.xlu2 %v383_v0, %s1491_s28 }
 0x7d7   :  { %78 = vperm.xlu2 %1384, %v51_v1  }
 0x829   :  { %v386_v2 = vpop.permute.xlu2 %385 }
 0x82a   :  { %v388_v3 = vadd.f32 %v386_v2, %v114_v48 }
 0x82c   :  { %1414 = vtanh.f32 %v388_v3 }
 0x831   :  { %v79_v24 = vpop.permute.xlu2 %78 }
 0x832   :  { %v1415_v4 = vpop.eup %1414  ;;  %v103_v25 = vmul.f32 %v1645_v11, %v79_v24 }
 0x833   :  { %392 = vrot.lane.b32.xlu0 %v1415_v4, %s1492_s2 }
 0x834   :  { %v115_v26 = vadd.f32 %v1650_v13, %v103_v25 }
 0x8a5   :  { %v393_v6 = vpop.permute.xlu0 %392 }
 0x8a6   :  { %v395_v9 = vmul.f32 %v393_v6, %v390_v5 }
 0x8a8   :  { %v1701_v10 = vadd.f32 %v396_v7, %v395_v9 }
 0x8aa   :  { %399 = vrot.lane.b32.xlu1 %v1701_v10, %s1492_s2 }
 0x91c   :  { %v400_v17 = vpop.permute.xlu1 %399 }
 0x91d   :  { %402 = vst.msk [vmem:[#allocation2 + $0x18] sm:$0xff] %vm127_vm0, %v400_v17  ;;  %1340 = vmatmul.msk.f32.vlgmr.msra.gmra.mxu0 %vm127_vm0, %v400_v17 }
 0x924   :  { %v675_v21 = vld [vmem:[#allocation2 + $0x18] sm:$0xff] }
 0x925   :  { %1348 = vmatmul.msk.f32.vlgmr.msrb.gmra.mxu0 %vm127_vm0, %v672_v18 }
 0x92d   :  { %1349 = vmatmul.msk.f32.gmra.mxu0 %vm127_vm0, %v673_v19 }
 0x935   :  { %1350 = vmatmul.msk.f32.gmra.mxu0 %vm127_vm0, %v674_v20 }
 0x93d   :  { %1351 = vmatmul.msk.f32.gmra.mxu0 %vm127_vm0, %v675_v21 }
 0x99a   :  { %v422_v22 = vpop.f32.mrf.mxu0 }
 0x99b   :  { %v445_v23 = vadd.f32 %v422_v22, %v1638_v8  ;;  %v425_v27 = vadd.f32 %v422_v22, %v115_v26 }
 0x99d   :  { %447 = vrot.lane.b32.xlu0 %v445_v23, %s1491_s28  ;;  %v1341_v28 = vmul.f32 -1.442695, %v425_v27 }
 0x99f   :  { %1416 = vpow2.f32 %v1341_v28 }
 0x9a5   :  { %v1417_v29 = vpop.eup %1416 }
 0x9a6   :  { %v429_v30 = vadd.f32 1.0, %v1417_v29 }
 0x9a8   :  { %1418 = vrcp.f32 %v429_v30  ;;  %v441_v36 = vand.u32 2147483648, %v429_v30  ;;  %vm435_vm3 = vweird.f32 %v429_v30  ;;  %v439_v37 = vand.u32 2147483647, %v429_v30 }
 0x9aa   :  { %v442_v39 = vor.u32 1.1754944e-38, %v441_v36  ;;  %vm440_vm5 = vcmp.eq.f32.partialorder %v439_v37, 8.507059e+37 }
 0x9ae   :  { %v1419_v31 = vpop.eup %1418 }
 0x9af   :  { %v431_v32 = vmul.f32 %v1419_v31, %v429_v30  ;;  %vm436_vm2 = vweird.f32 %v1419_v31 }
 0x9b0   :  { %vm437_vm4 = vmor %vm435_vm3, %vm436_vm2  ;;  %vm759_vm3 = vcmask 130048  }
 0x9b1   :  { %v432_v33 = vsub.f32 1.0, %v431_v32 }
 0x9b3   :  { %v433_v34 = vmul.f32 %v1419_v31, %v432_v33 }
 0x9b5   :  { %v434_v35 = vadd.f32 %v1419_v31, %v433_v34 }
 0x9b7   :  { %v438_v38 = vsel %vm437_vm4, %v1419_v31, %v434_v35 }
 0x9b8   :  { %v443_v41 = vsel %vm440_vm5, %v442_v39, %v438_v38 }
 0x9b9   :  { %v457_v47 = vsub.f32 1.0, %v443_v41  ;;  %v463_v49 = vmul.f32 %v443_v41, %v1701_v10 }
 0xa0f   :  { %v448_v40 = vpop.permute.xlu0 %447 }
 0xa10   :  { %v450_v42 = vmul.f32 %v448_v40, %v443_v41 }
 0xa12   :  { %452 = vrot.lane.b32.xlu1 %v450_v42, %s1491_s28 }
 0xa1a   :  { %83 = vperm.xlu1 %1385, %v52_v43  }
 0xa84   :  { %v453_v44 = vpop.permute.xlu1 %452 }
 0xa85   :  { %v455_v45 = vadd.f32 %v453_v44, %v115_v26 }
 0xa87   :  { %1420 = vtanh.f32 %v455_v45 }
 0xa8c   :  { %v84_v56 = vpop.permute.xlu1 %83 }
 0xa8d   :  { %v1421_v46 = vpop.eup %1420  ;;  %v104_v57 = vmul.f32 %v1645_v11, %v84_v56 }
 0xa8e   :  { %459 = vrot.lane.b32.xlu2 %v1421_v46, %s1492_s2  ;;  %v54_v46 = vld [vmem:[%s1903_s0 + $0x38] sm:$0xff] }
 0xa8f   :  { %v116_v58 = vadd.f32 %v1650_v13, %v104_v57 }
 0xae8   :  { %v460_v48 = vpop.permute.xlu2 %459 }
 0xae9   :  { %v462_v50 = vmul.f32 %v460_v48, %v457_v47 }
 0xaeb   :  { %v464_v51 = vadd.f32 %v463_v49, %v462_v50 }
 0xaed   :  { %466 = vrot.lane.b32.xlu0 %v464_v51, %s1492_s2 }
 0xb5f   :  { %v467_v52 = vpop.permute.xlu0 %466 }
 0xb60   :  { %469 = vst.msk [vmem:[#allocation2 + $0x20] sm:$0xff] %vm127_vm0, %v467_v52  ;;  %1342 = vmatmul.msk.f32.vlgmr.msra.gmra.mxu1 %vm127_vm0, %v467_v52 }
 0xb67   :  { %v676_v53 = vld [vmem:[#allocation2 + $0x20] sm:$0xff] }
 0xb68   :  { %1352 = vmatmul.msk.f32.gmra.mxu0 %vm127_vm0, %v676_v53 }
 0xbdd   :  { %v489_v54 = vpop.f32.mrf.mxu1 }
 0xbde   :  { %v512_v55 = vadd.f32 %v489_v54, %v1638_v8  ;;  %v492_v59 = vadd.f32 %v489_v54, %v116_v58 }
 0xbe0   :  { %514 = vrot.lane.b32.xlu2 %v512_v55, %s1491_s28  ;;  %v1343_v60 = vmul.f32 -1.442695, %v492_v59 }
 0xbe2   :  { %1422 = vpow2.f32 %v1343_v60 }
 0xbe8   :  { %v1423_v61 = vpop.eup %1422 }
 0xbe9   :  { %v496_v62 = vadd.f32 1.0, %v1423_v61 }
 0xbeb   :  { %1424 = vrcp.f32 %v496_v62  ;;  %v508_v4 = vand.u32 2147483648, %v496_v62  ;;  %vm502_vm7 = vweird.f32 %v496_v62  ;;  %v506_v5 = vand.u32 2147483647, %v496_v62 }
 0xbed   :  { %v509_v7 = vor.u32 1.1754944e-38, %v508_v4  ;;  %vm507_vm9 = vcmp.eq.f32.partialorder %v506_v5, 8.507059e+37 }
 0xbf1   :  { %v1425_v63 = vpop.eup %1424 }
 0xbf2   :  { %v498_v0 = vmul.f32 %v1425_v63, %v496_v62  ;;  %vm503_vm6 = vweird.f32 %v1425_v63 }
 0xbf3   :  { %vm504_vm8 = vmor %vm502_vm7, %vm503_vm6 }
 0xbf4   :  { %v499_v1 = vsub.f32 1.0, %v498_v0 }
 0xbf6   :  { %v500_v2 = vmul.f32 %v1425_v63, %v499_v1 }
 0xbf8   :  { %v501_v3 = vadd.f32 %v1425_v63, %v500_v2 }
 0xbfa   :  { %v505_v6 = vsel %vm504_vm8, %v1425_v63, %v501_v3 }
 0xbfb   :  { %v510_v10 = vsel %vm507_vm9, %v509_v7, %v505_v6 }
 0xbfc   :  { %v524_v18 = vsub.f32 1.0, %v510_v10  ;;  %v530_v20 = vmul.f32 %v510_v10, %v464_v51 }
 0xc3a   :  { %v515_v9 = vpop.permute.xlu2 %514 }
 0xc3b   :  { %v517_v12 = vmul.f32 %v515_v9, %v510_v10 }
 0xc3d   :  { %519 = vrot.lane.b32.xlu0 %v517_v12, %s1491_s28 }
 0xc45   :  { %88 = vperm.xlu0 %1383, %v53_v14  }
 0xcaf   :  { %v520_v15 = vpop.permute.xlu0 %519 }
 0xcb0   :  { %v522_v16 = vadd.f32 %v520_v15, %v116_v58 }
 0xcb2   :  { %1426 = vtanh.f32 %v522_v16 }
 0xcb7   :  { %v89_v27 = vpop.permute.xlu0 %88 }
 0xcb8   :  { %v1427_v17 = vpop.eup %1426  ;;  %v105_v28 = vmul.f32 %v1645_v11, %v89_v27  ;;  %v758_v27 = vld [vmem:[%s1909_s6] sm:$0xff]  ;;  %s1494_s6 = smov 16  }
 0xcb9   :  { %526 = vrot.lane.b32.xlu1 %v1427_v17, %s1492_s2  ;;  %v1772_v17 = vld [vmem:[%s1906_s8 + $0x8] sm:$0xff] }
 0xcba   :  { %v117_v29 = vadd.f32 %v1650_v13, %v105_v28  ;;  %777 = vmatpush.msra.mxu1 %v1772_v17  ;;  %848 = vmatpush.msrb.mxu2 %v1772_v17 }
 0xcbb   :  { %913 = vmatpush.msrb.mxu3 %v1772_v17 }
 0xd2b   :  { %v527_v19 = vpop.permute.xlu1 %526 }
 0xd2c   :  { %v529_v21 = vmul.f32 %v527_v19, %v524_v18 }
 0xd2e   :  { %v531_v22 = vadd.f32 %v530_v20, %v529_v21 }
 0xd30   :  { %533 = vrot.lane.b32.xlu2 %v531_v22, %s1492_s2 }
 0xd8a   :  { %v534_v23 = vpop.permute.xlu2 %533 }
 0xd8b   :  { %536 = vst.msk [vmem:[#allocation2 + $0x28] sm:$0xff] %vm127_vm0, %v534_v23  ;;  %1344 = vmatmul.msk.f32.vlgmr.msra.gmra.mxu2 %vm127_vm0, %v534_v23  ;;  %v1781_v23 = vld [vmem:[%s1906_s8] sm:$0xff] }
 0xd8c   :  { %778 = vmatpush.msra.mxu1 %v1781_v23  ;;  %849 = vmatpush.msrb.mxu2 %v1781_v23 }
 0xd8d   :  { %914 = vmatpush.msrb.mxu3 %v1781_v23 }
 0xd8e   :  { %1043 = vmatpush.msra.mxu2 %v1772_v17 }
 0xd90   :  { %1044 = vmatpush.msra.mxu2 %v1781_v23 }
 0xd92   :  { %v677_v24 = vld [vmem:[#allocation2 + $0x28] sm:$0xff] }
 0xd93   :  { %1353 = vmatmul.msk.f32.vlgmr.msrb.gmra.mxu1 %vm127_vm0, %v677_v24  ;;  %v1390_v24 = vld [vmem:[%s1907_s10] ss:$0 sm:$0xff] }
 0xd94   :  { %978 = vmatpush.msrb.mxu1 %v1772_v17 }
 0xd96   :  { %979 = vmatpush.msrb.mxu1 %v1781_v23 }
 0xe0e   :  { %v556_v25 = vpop.f32.mrf.mxu2 }
 0xe0f   :  { %v579_v26 = vadd.f32 %v556_v25, %v1638_v8  ;;  %v559_v30 = vadd.f32 %v556_v25, %v117_v29 }
 0xe10   :  { %v1808_v28 = vpop.f32.mrf.mxu1 }
 0xe11   :  { %581 = vrot.lane.b32.xlu1 %v579_v26, %s1491_s28  ;;  %v1345_v31 = vmul.f32 -1.442695, %v559_v30 }
 0xe13   :  { %1428 = vpow2.f32 %v1345_v31 }
 0xe19   :  { %v1429_v32 = vpop.eup %1428 }
 0xe1a   :  { %v563_v33 = vadd.f32 1.0, %v1429_v32 }
 0xe1c   :  { %1430 = vrcp.f32 %v563_v33  ;;  %v575_v39 = vand.u32 2147483648, %v563_v33  ;;  %vm569_vm11 = vweird.f32 %v563_v33  ;;  %v573_v40 = vand.u32 2147483647, %v563_v33 }
 0xe1e   :  { %v576_v42 = vor.u32 1.1754944e-38, %v575_v39  ;;  %vm574_vm13 = vcmp.eq.f32.partialorder %v573_v40, 8.507059e+37 }
 0xe22   :  { %v1431_v34 = vpop.eup %1430 }
 0xe23   :  { %v565_v35 = vmul.f32 %v1431_v34, %v563_v33  ;;  %vm570_vm10 = vweird.f32 %v1431_v34 }
 0xe24   :  { %vm571_vm12 = vmor %vm569_vm11, %vm570_vm10 }
 0xe25   :  { %v566_v36 = vsub.f32 1.0, %v565_v35  ;;  %v729_v35 = vpop.f32.mrf.mxu0 }
 0xe27   :  { %v567_v37 = vmul.f32 %v1431_v34, %v566_v36 }
 0xe29   :  { %v568_v38 = vadd.f32 %v1431_v34, %v567_v37 }
 0xe2b   :  { %v572_v41 = vsel %vm571_vm12, %v1431_v34, %v568_v38  ;;  %v1821_v34 = vld [vmem:[%s1905_s9] ss:$0 sm:$0xff]  ;;  %s1495_s9 = smov 112  }
 0xe2c   :  { %v577_v44 = vsel %vm574_vm13, %v576_v42, %v572_v41  ;;  %v730_v36 = vadd.f32 %v1821_v34, %v729_v35 }
 0xe2d   :  { %v591_v50 = vsub.f32 1.0, %v577_v44  ;;  %v597_v52 = vmul.f32 %v577_v44, %v531_v22 }
 0xe83   :  { %v582_v43 = vpop.permute.xlu1 %581 }
 0xe84   :  { %v584_v45 = vmul.f32 %v582_v43, %v577_v44 }
 0xe86   :  { %586 = vrot.lane.b32.xlu2 %v584_v45, %s1491_s28 }
 0xe8e   :  { %93 = vperm.xlu2 %1384, %v54_v46  }
 0xee0   :  { %v587_v47 = vpop.permute.xlu2 %586 }
 0xee1   :  { %v589_v48 = vadd.f32 %v587_v47, %v117_v29 }
 0xee3   :  { %1432 = vtanh.f32 %v589_v48 }
 0xee8   :  { %v94_v59 = vpop.permute.xlu2 %93 }
 0xee9   :  { %v1433_v49 = vpop.eup %1432  ;;  %v106_v60 = vmul.f32 %v1645_v11, %v94_v59 }
 0xeea   :  { %593 = vrot.lane.b32.xlu0 %v1433_v49, %s1492_s2 }
 0xeeb   :  { %v118_v61 = vadd.f32 %v1650_v13, %v106_v60 }
 0xf5c   :  { %v594_v51 = vpop.permute.xlu0 %593 }
 0xf5d   :  { %v596_v53 = vmul.f32 %v594_v51, %v591_v50 }
 0xf5f   :  { %v598_v54 = vadd.f32 %v597_v52, %v596_v53 }
 0xf61   :  { %600 = vrot.lane.b32.xlu1 %v598_v54, %s1492_s2 }
 0xfd3   :  { %v601_v55 = vpop.permute.xlu1 %600 }
 0xfd4   :  { %603 = vst.msk [vmem:[#allocation2 + $0x30] sm:$0xff] %vm127_vm0, %v601_v55  ;;  %1346 = vmatmul.msk.f32.vlgmr.msra.gmra.mxu3 %vm127_vm0, %v601_v55 }
 0xfd5   :  { %1108 = vmatpush.msra.mxu3 %v1772_v17 }
 0xfd7   :  { %1109 = vmatpush.msra.mxu3 %v1781_v23 }
 0xfdb   :  { %v678_v56 = vld [vmem:[#allocation2 + $0x30] sm:$0xff] }
 0xfdc   :  { %1354 = vmatmul.msk.f32.gmra.mxu1 %vm127_vm0, %v678_v56 }
0x1057   :  { %v623_v57 = vpop.f32.mrf.mxu3 }
0x1058   :  { %v646_v58 = vadd.f32 %v623_v57, %v1638_v8  ;;  %v626_v62 = vadd.f32 %v623_v57, %v118_v61 }
0x1059   :  { %v1810_v29 = vpop.f32.mrf.mxu1 }
0x105a   :  { %648 = vrot.lane.b32.xlu0 %v646_v58, %s1491_s28  ;;  %v1347_v63 = vmul.f32 -1.442695, %v626_v62 }
0x105c   :  { %1434 = vpow2.f32 %v1347_v63 }
0x1062   :  { %v1435_v0 = vpop.eup %1434 }
0x1063   :  { %v630_v1 = vadd.f32 1.0, %v1435_v0 }
0x1065   :  { %1436 = vrcp.f32 %v630_v1  ;;  %v642_v8 = vand.u32 2147483648, %v630_v1  ;;  %vm636_vm15 = vweird.f32 %v630_v1  ;;  %v640_v7 = vand.u32 2147483647, %v630_v1 }
0x1067   :  { %v643_v11 = vor.u32 1.1754944e-38, %v642_v8  ;;  %vm641_vm2 = vcmp.eq.f32.partialorder %v640_v7, 8.507059e+37 }
0x106b   :  { %v1437_v2 = vpop.eup %1436 }
0x106c   :  { %v632_v3 = vmul.f32 %v1437_v2, %v630_v1  ;;  %vm637_vm14 = vweird.f32 %v1437_v2  ;;  %v732_v1 = vpop.f32.mrf.mxu0 }
0x106d   :  { %vm638_vm1 = vmor %vm636_vm15, %vm637_vm14 }
0x106e   :  { %v633_v4 = vsub.f32 1.0, %v632_v3 }
0x1070   :  { %v634_v5 = vmul.f32 %v1437_v2, %v633_v4 }
0x1072   :  { %v635_v6 = vadd.f32 %v1437_v2, %v634_v5 }
0x1074   :  { %v639_v9 = vsel %vm638_vm1, %v1437_v2, %v635_v6  ;;  %v733_v2 = vadd.f32 %v1821_v34, %v732_v1  ;;  %v735_v35 = vpop.f32.mrf.mxu0 }
0x1075   :  { %v644_v10 = vsel %vm641_vm2, %v643_v11, %v639_v9 }
0x1076   :  { %v658_v18 = vsub.f32 1.0, %v644_v10  ;;  %v664_v20 = vmul.f32 %v644_v10, %v598_v54 }
0x10cc   :  { %v649_v13 = vpop.permute.xlu0 %648 }
0x10cd   :  { %v651_v12 = vmul.f32 %v649_v13, %v644_v10 }
0x10cf   :  { %653 = vrot.lane.b32.xlu1 %v651_v12, %s1491_s28 }
0x10d7   :  { %803 = vrot.lane.b32.xlu1 %v1390_v24, %s1493_s4 }
0x1141   :  { %v654_v14 = vpop.permute.xlu1 %653 }
0x1142   :  { %v656_v15 = vadd.f32 %v654_v14, %v118_v61 }
0x1144   :  { %1438 = vtanh.f32 %v656_v15 }
0x1149   :  { %v1814_v31 = vpop.permute.xlu1 %803 }
0x114a   :  { %v1439_v16 = vpop.eup %1438 }
0x114b   :  { %660 = vrot.lane.b32.xlu2 %v1439_v16, %s1492_s2 }
0x11a5   :  { %v661_v19 = vpop.permute.xlu2 %660 }
0x11a6   :  { %v663_v21 = vmul.f32 %v661_v19, %v658_v18 }
0x11a8   :  { %v665_v22 = vadd.f32 %v664_v20, %v663_v21 }
0x11aa   :  { %667 = vrot.lane.b32.xlu0 %v665_v22, %s1492_s2 }
0x121c   :  { %v668_v25 = vpop.permute.xlu0 %667 }
0x121d   :  { %670 = vst.msk [vmem:[#allocation2 + $0x38] sm:$0xff] %vm127_vm0, %v668_v25 }
0x121e   :  { %671 = vst.msk [vmem:[%s1908_s14] sm:$0xff] %vm127_vm0, %v668_v25 }
0x1224   :  { %v679_v26 = vld [vmem:[#allocation2 + $0x38] sm:$0xff] }
0x1225   :  { %1355 = vmatmul.msk.f32.gmra.mxu1 %vm127_vm0, %v679_v26 }
0x122d   :  { %1356 = vmatmul.msk.f32.vlgmr.msra.gmra.mxu1 %vm759_vm3, %v758_v27 }
0x122e   :  { %1173 = vmatpush.msra.mxu1 %v1772_v17 }
0x1230   :  { %1174 = vmatpush.msra.mxu1 %v1781_v23 }
0x12a2   :  { %v1812_v30 = vpop.f32.mrf.mxu1 }
0x12aa   :  { %v780_v32 = vpop.f32.mrf.mxu1 }
0x12ab   :  { %v806_v33 = vadd.f32 %v1814_v31, %v780_v32  ;;  %v783_v37 = vadd.f32 %v780_v32, %v730_v36 }
0x12ad   :  { %808 = vrot.lane.b32.xlu2 %v806_v33, %s1492_s2  ;;  %v1357_v38 = vmul.f32 -1.442695, %v783_v37 }
0x12af   :  { %1440 = vpow2.f32 %v1357_v38 }
0x12b5   :  { %824 = vrot.lane.b32.xlu2 %v758_v27, %s1494_s6  ;;  %v1441_v39 = vpop.eup %1440 }
0x12b6   :  { %v787_v40 = vadd.f32 1.0, %v1441_v39 }
0x12b8   :  { %1442 = vrcp.f32 %v787_v40  ;;  %v799_v46 = vand.u32 2147483648, %v787_v40  ;;  %vm793_vm4 = vweird.f32 %v787_v40  ;;  %v797_v47 = vand.u32 2147483647, %v787_v40 }
0x12ba   :  { %v800_v49 = vor.u32 1.1754944e-38, %v799_v46  ;;  %vm798_vm6 = vcmp.eq.f32.partialorder %v797_v47, 8.507059e+37 }
0x12be   :  { %v1443_v41 = vpop.eup %1442 }
0x12bf   :  { %v789_v42 = vmul.f32 %v1443_v41, %v787_v40  ;;  %vm794_vm0 = vweird.f32 %v1443_v41 }
0x12c0   :  { %vm795_vm5 = vmor %vm793_vm4, %vm794_vm0 }
0x12c1   :  { %v790_v43 = vsub.f32 1.0, %v789_v42 }
0x12c3   :  { %v791_v44 = vmul.f32 %v1443_v41, %v790_v43 }
0x12c5   :  { %v792_v45 = vadd.f32 %v1443_v41, %v791_v44 }
0x12c7   :  { %v796_v48 = vsel %vm795_vm5, %v1443_v41, %v792_v45 }
0x12c8   :  { %v801_v50 = vsel %vm798_vm6, %v800_v49, %v796_v48 }
0x12c9   :  { %v818_v57 = vsub.f32 1.0, %v801_v50 }
0x1307   :  { %v809_v51 = vpop.permute.xlu2 %808 }
0x1308   :  { %v811_v52 = vmul.f32 %v809_v51, %v801_v50 }
0x130a   :  { %813 = vrot.lane.b32.xlu0 %v811_v52, %s1493_s4 }
0x130f   :  { %v825_v56 = vpop.permute.xlu2 %824 }
0x1310   :  { %v827_v59 = vmul.f32 %v825_v56, %v801_v50 }
0x137c   :  { %v814_v53 = vpop.permute.xlu0 %813 }
0x137d   :  { %v816_v54 = vadd.f32 %v814_v53, %v730_v36  ;;  %v736_v36 = vadd.f32 %v1821_v34, %v735_v35 }
0x137f   :  { %1444 = vtanh.f32 %v816_v54 }
0x1385   :  { %v1445_v55 = vpop.eup %1444 }
0x1386   :  { %820 = vrot.lane.b32.xlu1 %v1445_v55, %s1495_s9 }
0x13f8   :  { %v821_v58 = vpop.permute.xlu1 %820 }
0x13f9   :  { %v823_v60 = vmul.f32 %v821_v58, %v818_v57 }
0x13fb   :  { %v828_v61 = vadd.f32 %v827_v59, %v823_v60 }
0x13fd   :  { %830 = vrot.lane.b32.xlu0 %v828_v61, %s1495_s9 }
0x146f   :  { %v831_v62 = vpop.permute.xlu0 %830 }
0x1470   :  { %1358 = vmatmul.msk.f32.vlgmr.msrb.gmra.mxu2 %vm759_vm3, %v831_v62 }
0x1471   :  { %1238 = vmatpush.msrb.mxu2 %v1772_v17 }
0x1473   :  { %1239 = vmatpush.msrb.mxu2 %v1781_v23 }
0x14f3   :  { %v851_v63 = vpop.f32.mrf.mxu2 }
0x14f4   :  { %v874_v0 = vadd.f32 %v851_v63, %v1814_v31  ;;  %v854_v3 = vadd.f32 %v851_v63, %v733_v2 }
0x14f6   :  { %876 = vrot.lane.b32.xlu1 %v874_v0, %s1492_s2  ;;  %v1359_v4 = vmul.f32 -1.442695, %v854_v3  ;;  %v738_v0 = vpop.f32.mrf.mxu0 }
0x14f7   :  { %v739_v1 = vadd.f32 %v1821_v34, %v738_v0 }
0x14f8   :  { %1446 = vpow2.f32 %v1359_v4 }
0x14fe   :  { %v1447_v5 = vpop.eup %1446 }
0x14ff   :  { %v858_v6 = vadd.f32 1.0, %v1447_v5 }
0x1501   :  { %1448 = vrcp.f32 %v858_v6  ;;  %v870_v10 = vand.u32 2147483648, %v858_v6  ;;  %vm864_vm8 = vweird.f32 %v858_v6  ;;  %v868_v12 = vand.u32 2147483647, %v858_v6 }
0x1503   :  { %v871_v15 = vor.u32 1.1754944e-38, %v870_v10  ;;  %vm869_vm10 = vcmp.eq.f32.partialorder %v868_v12, 8.507059e+37 }
0x1507   :  { %v1449_v8 = vpop.eup %1448 }
0x1508   :  { %v860_v7 = vmul.f32 %v1449_v8, %v858_v6  ;;  %vm865_vm7 = vweird.f32 %v1449_v8 }
0x1509   :  { %vm866_vm9 = vmor %vm864_vm8, %vm865_vm7 }
0x150a   :  { %v861_v9 = vsub.f32 1.0, %v860_v7 }
0x150c   :  { %v862_v11 = vmul.f32 %v1449_v8, %v861_v9 }
0x150e   :  { %v863_v13 = vadd.f32 %v1449_v8, %v862_v11 }
0x1510   :  { %v867_v14 = vsel %vm866_vm9, %v1449_v8, %v863_v13 }
0x1511   :  { %v872_v17 = vsel %vm869_vm10, %v871_v15, %v867_v14 }
0x1512   :  { %v886_v22 = vsub.f32 1.0, %v872_v17  ;;  %v892_v24 = vmul.f32 %v872_v17, %v828_v61 }
0x1568   :  { %v877_v16 = vpop.permute.xlu1 %876 }
0x1569   :  { %v879_v18 = vmul.f32 %v877_v16, %v872_v17 }
0x156b   :  { %881 = vrot.lane.b32.xlu2 %v879_v18, %s1493_s4 }
0x15c5   :  { %v882_v19 = vpop.permute.xlu2 %881 }
0x15c6   :  { %v884_v20 = vadd.f32 %v882_v19, %v733_v2 }
0x15c8   :  { %1450 = vtanh.f32 %v884_v20 }
0x15ce   :  { %v1451_v21 = vpop.eup %1450 }
0x15cf   :  { %888 = vrot.lane.b32.xlu0 %v1451_v21, %s1495_s9 }
0x1641   :  { %v889_v23 = vpop.permute.xlu0 %888 }
0x1642   :  { %v891_v25 = vmul.f32 %v889_v23, %v886_v22 }
0x1644   :  { %v893_v26 = vadd.f32 %v892_v24, %v891_v25 }
0x1646   :  { %895 = vrot.lane.b32.xlu1 %v893_v26, %s1495_s9 }
0x16b8   :  { %v896_v27 = vpop.permute.xlu1 %895 }
0x16b9   :  { %1360 = vmatmul.msk.f32.vlgmr.msrb.gmra.mxu3 %vm759_vm3, %v896_v27 }
0x173c   :  { %v916_v32 = vpop.f32.mrf.mxu3 }
0x173d   :  { %v939_v33 = vadd.f32 %v916_v32, %v1814_v31  ;;  %v919_v37 = vadd.f32 %v916_v32, %v736_v36 }
0x173f   :  { %941 = vrot.lane.b32.xlu2 %v939_v33, %s1492_s2  ;;  %v1361_v38 = vmul.f32 -1.442695, %v919_v37  ;;  %v741_v33 = vpop.f32.mrf.mxu0 }
0x1740   :  { %v742_v35 = vadd.f32 %v1821_v34, %v741_v33 }
0x1741   :  { %1452 = vpow2.f32 %v1361_v38 }
0x1747   :  { %v1453_v39 = vpop.eup %1452 }
0x1748   :  { %v923_v40 = vadd.f32 1.0, %v1453_v39 }
0x174a   :  { %1454 = vrcp.f32 %v923_v40  ;;  %v935_v46 = vand.u32 2147483648, %v923_v40  ;;  %vm929_vm12 = vweird.f32 %v923_v40  ;;  %v933_v47 = vand.u32 2147483647, %v923_v40 }
0x174c   :  { %v936_v49 = vor.u32 1.1754944e-38, %v935_v46  ;;  %vm934_vm14 = vcmp.eq.f32.partialorder %v933_v47, 8.507059e+37 }
0x1750   :  { %v1455_v41 = vpop.eup %1454 }
0x1751   :  { %v925_v42 = vmul.f32 %v1455_v41, %v923_v40  ;;  %vm930_vm11 = vweird.f32 %v1455_v41 }
0x1752   :  { %vm931_vm13 = vmor %vm929_vm12, %vm930_vm11 }
0x1753   :  { %v926_v43 = vsub.f32 1.0, %v925_v42 }
0x1755   :  { %v927_v44 = vmul.f32 %v1455_v41, %v926_v43 }
0x1757   :  { %v928_v45 = vadd.f32 %v1455_v41, %v927_v44 }
0x1759   :  { %v932_v48 = vsel %vm931_vm13, %v1455_v41, %v928_v45 }
0x175a   :  { %v937_v51 = vsel %vm934_vm14, %v936_v49, %v932_v48 }
0x175b   :  { %v951_v56 = vsub.f32 1.0, %v937_v51  ;;  %v957_v58 = vmul.f32 %v937_v51, %v893_v26 }
0x1799   :  { %v942_v50 = vpop.permute.xlu2 %941 }
0x179a   :  { %v944_v52 = vmul.f32 %v942_v50, %v937_v51 }
0x179c   :  { %946 = vrot.lane.b32.xlu0 %v944_v52, %s1493_s4 }
0x180e   :  { %v947_v53 = vpop.permute.xlu0 %946 }
0x180f   :  { %v949_v54 = vadd.f32 %v947_v53, %v736_v36 }
0x1811   :  { %1456 = vtanh.f32 %v949_v54 }
0x1817   :  { %v1457_v55 = vpop.eup %1456 }
0x1818   :  { %953 = vrot.lane.b32.xlu1 %v1457_v55, %s1495_s9 }
0x188a   :  { %v954_v57 = vpop.permute.xlu1 %953 }
0x188b   :  { %v956_v59 = vmul.f32 %v954_v57, %v951_v56 }
0x188d   :  { %v958_v60 = vadd.f32 %v957_v58, %v956_v59 }
0x188f   :  { %960 = vrot.lane.b32.xlu2 %v958_v60, %s1495_s9 }
0x18e9   :  { %v961_v61 = vpop.permute.xlu2 %960 }
0x18ea   :  { %1362 = vmatmul.msk.f32.vlgmr.msrb.gmra.mxu1 %vm759_vm3, %v961_v61 }
0x1967   :  { %v981_v62 = vpop.f32.mrf.mxu1 }
0x1968   :  { %v1004_v63 = vadd.f32 %v981_v62, %v1814_v31  ;;  %v984_v2 = vadd.f32 %v981_v62, %v739_v1 }
0x196a   :  { %1006 = vrot.lane.b32.xlu0 %v1004_v63, %s1492_s2  ;;  %v1363_v3 = vmul.f32 -1.442695, %v984_v2  ;;  %v745_v63 = vadd.f32 %v1821_v34, %v1808_v28 }
0x196c   :  { %1458 = vpow2.f32 %v1363_v3 }
0x1972   :  { %v1459_v4 = vpop.eup %1458 }
0x1973   :  { %v988_v5 = vadd.f32 1.0, %v1459_v4 }
0x1975   :  { %1460 = vrcp.f32 %v988_v5  ;;  %v1000_v13 = vand.u32 2147483648, %v988_v5  ;;  %vm994_vm1 = vweird.f32 %v988_v5  ;;  %v998_v10 = vand.u32 2147483647, %v988_v5 }
0x1977   :  { %v1001_v14 = vor.u32 1.1754944e-38, %v1000_v13  ;;  %vm999_vm0 = vcmp.eq.f32.partialorder %v998_v10, 8.507059e+37 }
0x197b   :  { %v1461_v6 = vpop.eup %1460 }
0x197c   :  { %v990_v8 = vmul.f32 %v1461_v6, %v988_v5  ;;  %vm995_vm15 = vweird.f32 %v1461_v6 }
0x197d   :  { %vm996_vm2 = vmor %vm994_vm1, %vm995_vm15 }
0x197e   :  { %v991_v7 = vsub.f32 1.0, %v990_v8 }
0x1980   :  { %v992_v9 = vmul.f32 %v1461_v6, %v991_v7 }
0x1982   :  { %v993_v11 = vadd.f32 %v1461_v6, %v992_v9 }
0x1984   :  { %v997_v12 = vsel %vm996_vm2, %v1461_v6, %v993_v11 }
0x1985   :  { %v1002_v16 = vsel %vm999_vm0, %v1001_v14, %v997_v12 }
0x1986   :  { %v1016_v21 = vsub.f32 1.0, %v1002_v16  ;;  %v1022_v23 = vmul.f32 %v1002_v16, %v958_v60 }
0x19dc   :  { %v1007_v15 = vpop.permute.xlu0 %1006 }
0x19dd   :  { %v1009_v17 = vmul.f32 %v1007_v15, %v1002_v16 }
0x19df   :  { %1011 = vrot.lane.b32.xlu1 %v1009_v17, %s1493_s4 }
0x1a51   :  { %v1012_v18 = vpop.permute.xlu1 %1011 }
0x1a52   :  { %v1014_v19 = vadd.f32 %v1012_v18, %v739_v1 }
0x1a54   :  { %1462 = vtanh.f32 %v1014_v19 }
0x1a5a   :  { %v1463_v20 = vpop.eup %1462 }
0x1a5b   :  { %1018 = vrot.lane.b32.xlu2 %v1463_v20, %s1495_s9 }
0x1ab5   :  { %v1019_v22 = vpop.permute.xlu2 %1018 }
0x1ab6   :  { %v1021_v24 = vmul.f32 %v1019_v22, %v1016_v21 }
0x1ab8   :  { %v1023_v25 = vadd.f32 %v1022_v23, %v1021_v24 }
0x1aba   :  { %1025 = vrot.lane.b32.xlu0 %v1023_v25, %s1495_s9 }
0x1b2c   :  { %v1026_v26 = vpop.permute.xlu0 %1025 }
0x1b2d   :  { %1364 = vmatmul.msk.f32.vlgmr.msra.gmra.mxu2 %vm759_vm3, %v1026_v26  ;;  %v748_v26 = vadd.f32 %v1821_v34, %v1810_v29 }
0x1bb0   :  { %v1046_v27 = vpop.f32.mrf.mxu2 }
0x1bb1   :  { %v1069_v32 = vadd.f32 %v1046_v27, %v1814_v31  ;;  %v1049_v36 = vadd.f32 %v1046_v27, %v742_v35 }
0x1bb3   :  { %1071 = vrot.lane.b32.xlu1 %v1069_v32, %s1492_s2  ;;  %v1365_v37 = vmul.f32 -1.442695, %v1049_v36 }
0x1bb5   :  { %1464 = vpow2.f32 %v1365_v37 }
0x1bbb   :  { %v1465_v38 = vpop.eup %1464 }
0x1bbc   :  { %v1053_v39 = vadd.f32 1.0, %v1465_v38 }
0x1bbe   :  { %1466 = vrcp.f32 %v1053_v39  ;;  %v1065_v45 = vand.u32 2147483648, %v1053_v39  ;;  %vm1059_vm5 = vweird.f32 %v1053_v39  ;;  %v1063_v46 = vand.u32 2147483647, %v1053_v39 }
0x1bc0   :  { %v1066_v48 = vor.u32 1.1754944e-38, %v1065_v45  ;;  %vm1064_vm7 = vcmp.eq.f32.partialorder %v1063_v46, 8.507059e+37 }
0x1bc4   :  { %v1467_v40 = vpop.eup %1466 }
0x1bc5   :  { %v1055_v41 = vmul.f32 %v1467_v40, %v1053_v39  ;;  %vm1060_vm4 = vweird.f32 %v1467_v40 }
0x1bc6   :  { %vm1061_vm6 = vmor %vm1059_vm5, %vm1060_vm4  ;;  %vm1318_vm5 = vcmask 64512  }
0x1bc7   :  { %v1056_v42 = vsub.f32 1.0, %v1055_v41 }
0x1bc9   :  { %v1057_v43 = vmul.f32 %v1467_v40, %v1056_v42 }
0x1bcb   :  { %v1058_v44 = vadd.f32 %v1467_v40, %v1057_v43 }
0x1bcd   :  { %v1062_v47 = vsel %vm1061_vm6, %v1467_v40, %v1058_v44 }
0x1bce   :  { %v1067_v50 = vsel %vm1064_vm7, %v1066_v48, %v1062_v47 }
0x1bcf   :  { %v1081_v55 = vsub.f32 1.0, %v1067_v50  ;;  %v1087_v57 = vmul.f32 %v1067_v50, %v1023_v25 }
0x1c25   :  { %v1072_v49 = vpop.permute.xlu1 %1071 }
0x1c26   :  { %v1074_v51 = vmul.f32 %v1072_v49, %v1067_v50 }
0x1c28   :  { %1076 = vrot.lane.b32.xlu2 %v1074_v51, %s1493_s4 }
0x1c82   :  { %v1077_v52 = vpop.permute.xlu2 %1076 }
0x1c83   :  { %v1079_v53 = vadd.f32 %v1077_v52, %v742_v35 }
0x1c85   :  { %1468 = vtanh.f32 %v1079_v53 }
0x1c8b   :  { %v1469_v54 = vpop.eup %1468 }
0x1c8c   :  { %1083 = vrot.lane.b32.xlu0 %v1469_v54, %s1495_s9 }
0x1cfe   :  { %v1084_v56 = vpop.permute.xlu0 %1083 }
0x1cff   :  { %v1086_v58 = vmul.f32 %v1084_v56, %v1081_v55 }
0x1d01   :  { %v1088_v59 = vadd.f32 %v1087_v57, %v1086_v58  ;;  %v751_v58 = vadd.f32 %v1821_v34, %v1812_v30 }
0x1d03   :  { %1090 = vrot.lane.b32.xlu1 %v1088_v59, %s1495_s9 }
0x1d75   :  { %v1091_v60 = vpop.permute.xlu1 %1090 }
0x1d76   :  { %1366 = vmatmul.msk.f32.vlgmr.msra.gmra.mxu3 %vm759_vm3, %v1091_v60 }
0x1df9   :  { %v1111_v61 = vpop.f32.mrf.mxu3 }
0x1dfa   :  { %v1134_v62 = vadd.f32 %v1111_v61, %v1814_v31  ;;  %v1114_v0 = vadd.f32 %v1111_v61, %v745_v63 }
0x1dfc   :  { %1136 = vrot.lane.b32.xlu2 %v1134_v62, %s1492_s2  ;;  %v1367_v1 = vmul.f32 -1.442695, %v1114_v0 }
0x1dfe   :  { %1470 = vpow2.f32 %v1367_v1 }
0x1e04   :  { %v1471_v2 = vpop.eup %1470 }
0x1e05   :  { %v1118_v3 = vadd.f32 1.0, %v1471_v2 }
0x1e07   :  { %1472 = vrcp.f32 %v1118_v3  ;;  %v1130_v9 = vand.u32 2147483648, %v1118_v3  ;;  %vm1124_vm9 = vweird.f32 %v1118_v3  ;;  %v1128_v11 = vand.u32 2147483647, %v1118_v3 }
0x1e09   :  { %v1131_v10 = vor.u32 1.1754944e-38, %v1130_v9  ;;  %vm1129_vm11 = vcmp.eq.f32.partialorder %v1128_v11, 8.507059e+37 }
0x1e0d   :  { %v1473_v4 = vpop.eup %1472 }
0x1e0e   :  { %v1120_v5 = vmul.f32 %v1473_v4, %v1118_v3  ;;  %vm1125_vm8 = vweird.f32 %v1473_v4 }
0x1e0f   :  { %vm1126_vm10 = vmor %vm1124_vm9, %vm1125_vm8 }
0x1e10   :  { %v1121_v6 = vsub.f32 1.0, %v1120_v5 }
0x1e12   :  { %v1122_v8 = vmul.f32 %v1473_v4, %v1121_v6 }
0x1e14   :  { %v1123_v7 = vadd.f32 %v1473_v4, %v1122_v8 }
0x1e16   :  { %v1127_v13 = vsel %vm1126_vm10, %v1473_v4, %v1123_v7 }
0x1e17   :  { %v1132_v12 = vsel %vm1129_vm11, %v1131_v10, %v1127_v13  ;;  %v1290_v13 = vld [vmem:[%s1910_s11 + $0x8] sm:$0xff]  ;;  %v1289_v10 = vld [vmem:[%s1910_s11] sm:$0xff] }
0x1e18   :  { %v1146_v18 = vsub.f32 1.0, %v1132_v12  ;;  %v1152_v20 = vmul.f32 %v1132_v12, %v1088_v59  ;;  %1311 = vmatpush.msrb.mxu3 %v1290_v13 }
0x1e1a   :  { %1312 = vmatpush.msrb.mxu3 %v1289_v10 }
0x1e56   :  { %v1137_v28 = vpop.permute.xlu2 %1136 }
0x1e57   :  { %v1139_v14 = vmul.f32 %v1137_v28, %v1132_v12 }
0x1e59   :  { %1141 = vrot.lane.b32.xlu0 %v1139_v14, %s1493_s4 }
0x1ecb   :  { %v1142_v15 = vpop.permute.xlu0 %1141 }
0x1ecc   :  { %v1144_v16 = vadd.f32 %v1142_v15, %v745_v63 }
0x1ece   :  { %1474 = vtanh.f32 %v1144_v16 }
0x1ed4   :  { %v1475_v17 = vpop.eup %1474 }
0x1ed5   :  { %1148 = vrot.lane.b32.xlu1 %v1475_v17, %s1495_s9 }
0x1f47   :  { %v1149_v19 = vpop.permute.xlu1 %1148 }
0x1f48   :  { %v1151_v21 = vmul.f32 %v1149_v19, %v1146_v18  ;;  %v1391_v18 = vld [vmem:[%s1911_s12] ss:$0 sm:$0xff] }
0x1f4a   :  { %v1153_v22 = vadd.f32 %v1152_v20, %v1151_v21 }
0x1f4c   :  { %1155 = vrot.lane.b32.xlu2 %v1153_v22, %s1495_s9 }
0x1fa6   :  { %v1156_v23 = vpop.permute.xlu2 %1155 }
0x1fa7   :  { %1368 = vmatmul.msk.f32.vlgmr.msra.gmra.mxu1 %vm759_vm3, %v1156_v23 }
0x2024   :  { %v1176_v24 = vpop.f32.mrf.mxu1 }
0x2025   :  { %v1199_v25 = vadd.f32 %v1176_v24, %v1814_v31  ;;  %v1179_v27 = vadd.f32 %v1176_v24, %v748_v26 }
0x2027   :  { %1201 = vrot.lane.b32.xlu0 %v1199_v25, %s1492_s2  ;;  %v1369_v32 = vmul.f32 -1.442695, %v1179_v27 }
0x2029   :  { %1476 = vpow2.f32 %v1369_v32 }
0x202f   :  { %v1477_v33 = vpop.eup %1476 }
0x2030   :  { %v1183_v35 = vadd.f32 1.0, %v1477_v33 }
0x2032   :  { %1478 = vrcp.f32 %v1183_v35  ;;  %v1195_v41 = vand.u32 2147483648, %v1183_v35  ;;  %vm1189_vm13 = vweird.f32 %v1183_v35  ;;  %v1193_v42 = vand.u32 2147483647, %v1183_v35 }
0x2034   :  { %v1196_v44 = vor.u32 1.1754944e-38, %v1195_v41  ;;  %vm1194_vm15 = vcmp.eq.f32.partialorder %v1193_v42, 8.507059e+37 }
0x2038   :  { %v1479_v36 = vpop.eup %1478 }
0x2039   :  { %v1185_v37 = vmul.f32 %v1479_v36, %v1183_v35  ;;  %vm1190_vm12 = vweird.f32 %v1479_v36 }
0x203a   :  { %vm1191_vm14 = vmor %vm1189_vm13, %vm1190_vm12 }
0x203b   :  { %v1186_v38 = vsub.f32 1.0, %v1185_v37 }
0x203d   :  { %v1187_v39 = vmul.f32 %v1479_v36, %v1186_v38 }
0x203f   :  { %v1188_v40 = vadd.f32 %v1479_v36, %v1187_v39 }
0x2041   :  { %v1192_v43 = vsel %vm1191_vm14, %v1479_v36, %v1188_v40 }
0x2042   :  { %v1197_v45 = vsel %vm1194_vm15, %v1196_v44, %v1192_v43 }
0x2043   :  { %v1211_v50 = vsub.f32 1.0, %v1197_v45  ;;  %v1217_v52 = vmul.f32 %v1197_v45, %v1153_v22 }
0x2099   :  { %v1202_v29 = vpop.permute.xlu0 %1201 }
0x209a   :  { %v1204_v46 = vmul.f32 %v1202_v29, %v1197_v45 }
0x209c   :  { %1206 = vrot.lane.b32.xlu1 %v1204_v46, %s1493_s4 }
0x210e   :  { %v1207_v47 = vpop.permute.xlu1 %1206 }
0x210f   :  { %v1209_v48 = vadd.f32 %v1207_v47, %v748_v26 }
0x2111   :  { %1480 = vtanh.f32 %v1209_v48 }
0x2117   :  { %v1481_v49 = vpop.eup %1480 }
0x2118   :  { %1213 = vrot.lane.b32.xlu2 %v1481_v49, %s1495_s9 }
0x2172   :  { %v1214_v51 = vpop.permute.xlu2 %1213 }
0x2173   :  { %v1216_v53 = vmul.f32 %v1214_v51, %v1211_v50 }
0x2175   :  { %v1218_v54 = vadd.f32 %v1217_v52, %v1216_v53 }
0x2177   :  { %1220 = vrot.lane.b32.xlu0 %v1218_v54, %s1495_s9 }
0x21e9   :  { %v1221_v55 = vpop.permute.xlu0 %1220 }
0x21ea   :  { %1370 = vmatmul.msk.f32.vlgmr.msrb.gmra.mxu2 %vm759_vm3, %v1221_v55 }
0x226d   :  { %v1241_v56 = vpop.f32.mrf.mxu2 }
0x226e   :  { %v1264_v57 = vadd.f32 %v1241_v56, %v1814_v31  ;;  %v1244_v59 = vadd.f32 %v1241_v56, %v751_v58 }
0x2270   :  { %1266 = vrot.lane.b32.xlu1 %v1264_v57, %s1492_s2  ;;  %v1371_v60 = vmul.f32 -1.442695, %v1244_v59 }
0x2272   :  { %1482 = vpow2.f32 %v1371_v60 }
0x2278   :  { %v1483_v61 = vpop.eup %1482 }
0x2279   :  { %v1248_v62 = vadd.f32 1.0, %v1483_v61 }
0x227b   :  { %1484 = vrcp.f32 %v1248_v62  ;;  %v1260_v4 = vand.u32 2147483648, %v1248_v62  ;;  %vm1254_vm2 = vweird.f32 %v1248_v62  ;;  %v1258_v31 = vand.u32 2147483647, %v1248_v62 }
0x227d   :  { %v1261_v6 = vor.u32 1.1754944e-38, %v1260_v4  ;;  %vm1259_vm4 = vcmp.eq.f32.partialorder %v1258_v31, 8.507059e+37 }
0x2281   :  { %v1485_v63 = vpop.eup %1484 }
0x2282   :  { %v1250_v0 = vmul.f32 %v1485_v63, %v1248_v62  ;;  %vm1255_vm1 = vweird.f32 %v1485_v63 }
0x2283   :  { %vm1256_vm0 = vmor %vm1254_vm2, %vm1255_vm1 }
0x2284   :  { %v1251_v1 = vsub.f32 1.0, %v1250_v0 }
0x2286   :  { %v1252_v2 = vmul.f32 %v1485_v63, %v1251_v1 }
0x2288   :  { %v1253_v3 = vadd.f32 %v1485_v63, %v1252_v2 }
0x228a   :  { %v1257_v5 = vsel %vm1256_vm0, %v1485_v63, %v1253_v3 }
0x228b   :  { %v1262_v34 = vsel %vm1259_vm4, %v1261_v6, %v1257_v5 }
0x228c   :  { %v1276_v28 = vsub.f32 1.0, %v1262_v34  ;;  %v1282_v14 = vmul.f32 %v1262_v34, %v1218_v54 }
0x22e2   :  { %v1267_v30 = vpop.permute.xlu1 %1266 }
0x22e3   :  { %v1269_v8 = vmul.f32 %v1267_v30, %v1262_v34 }
0x22e5   :  { %1271 = vrot.lane.b32.xlu2 %v1269_v8, %s1493_s4 }
0x233f   :  { %v1272_v7 = vpop.permute.xlu2 %1271 }
0x2340   :  { %v1274_v9 = vadd.f32 %v1272_v7, %v751_v58 }
0x2342   :  { %1486 = vtanh.f32 %v1274_v9 }
0x2348   :  { %v1487_v11 = vpop.eup %1486 }
0x2349   :  { %1278 = vrot.lane.b32.xlu0 %v1487_v11, %s1495_s9 }
0x23bb   :  { %v1279_v12 = vpop.permute.xlu0 %1278 }
0x23bc   :  { %v1281_v15 = vmul.f32 %v1279_v12, %v1276_v28 }
0x23be   :  { %v1283_v16 = vadd.f32 %v1282_v14, %v1281_v15 }
0x23c0   :  { %1285 = vrot.lane.b32.xlu1 %v1283_v16, %s1495_s9 }
0x2432   :  { %v1286_v17 = vpop.permute.xlu1 %1285 }
0x2433   :  { %1288 = vst.msk [vmem:[%s1912_s15] sm:$0xff] %vm759_vm3, %v1286_v17  ;;  %1372 = vmatmul.msk.f32.vlgmr.msrb.gmra.mxu3 %vm759_vm3, %v1286_v17 }
0x24b6   :  { %v1314_v19 = vpop.f32.mrf.mxu3 }
0x24b7   :  { %v1315_v20 = vadd.f32 %v1391_v18, %v1314_v19 }
0x24b9   :  { %1488 = vtanh.f32 %v1315_v20 }
0x24bf   :  { %v1489_v21 = vpop.eup %1488 }
0x24c0   :  { %1319 = vst.msk [vmem:[%s1913_s13] sm:$0xff] %vm1318_vm5, %v1489_v21 }

</bundles_post_ra>
